<compile_context>
chip_gen: v5e
topology: v5e:2x2
jax: 0.10.0
libtpu: 0.0.40
codegen_flags: <defaults>
</compile_context>

<pallas_src>
import functools

import jax
import jax.numpy as jnp
import numpy as np
from jax import lax
from jax.experimental import pallas as pl
from jax.experimental.pallas import tpu as pltpu

KERNEL_SIZE = 7
PAD = KERNEL_SIZE // 2


def _round_up(v, m):
    return (v + m - 1) // m * m


def _bev_geom_attention_kernel(w_ref, x_ref, prob_ref, o_ref,
                               sum_ref, max_ref, *, C, H, W, K):
    """One grid step = one (batch element, channel chunk).

    w_ref   : SMEM (2*K*K,)   flattened conv weight, index = c*K*K + ky*K + kx
    x_ref   : VMEM (tC, H, W) channel chunk of this batch element
    prob_ref: VMEM (Hp, Wp)   bev_prob, zero-padded to the lane-dense tile
    o_ref   : VMEM (Hp, Wp)   output tile (valid region [:H, :W])
    sum_ref : VMEM (Hp, Wp) f32 running channel sum (padded region stays 0)
    max_ref : VMEM (Hp, Wp) f32 running channel max
    """
    pad = K // 2
    Hp, Wp = sum_ref.shape
    c_step = pl.program_id(1)
    last_c = pl.num_programs(1) - 1

    # ---- init accumulators at the first channel chunk of each batch element.
    @pl.when(c_step == 0)
    def _init():
        sum_ref[...] = jnp.zeros_like(sum_ref)
        max_ref[...] = jnp.full_like(max_ref, -jnp.inf)

    # ---- streaming channel reduction over this chunk (f32 accumulation).
    xc = x_ref[...].astype(jnp.float32)                        # (tC, H, W)
    sum_ref[:H, :W] = sum_ref[:H, :W] + jnp.sum(xc, axis=0)
    max_ref[:H, :W] = jnp.maximum(max_ref[:H, :W], jnp.max(xc, axis=0))

    # ---- finalize: mean, KxK conv (roll-based shift-and-accumulate), sigmoid.
    @pl.when(c_step == last_c)
    def _finalize():
        row = lax.broadcasted_iota(jnp.int32, (Hp, Wp), 0)
        col = lax.broadcasted_iota(jnp.int32, (Hp, Wp), 1)
        valid = (row < H) & (col < W)

        zero = jnp.zeros((Hp, Wp), jnp.float32)
        # mean via one scalar multiply; zero the padded strips (max init is
        # -inf there) so taps landing in the padding act like conv zero-pad.
        avg = jnp.where(valid, sum_ref[...] * jnp.float32(1.0 / C), zero)
        mx = jnp.where(valid, max_ref[...], zero)

        # Border masks per tap offset (shared by both conv input channels);
        # they reproduce the conv's zero padding at the true (H, W) bounds and
        # kill the wrap-around of the rolls.
        col_ok = [(col + (kx - pad) >= 0) & (col + (kx - pad) < W)
                  for kx in range(K)]
        row_ok = [(row + (ky - pad) >= 0) & (row + (ky - pad) < H)
                  for ky in range(K)]

        acc = zero
        for c, feat in enumerate((avg, mx)):
            # Lane (W) shifts: computed once per kx, reused for every ky.
            lane_sh = []
            for kx in range(K):
                dx = kx - pad
                s = feat if dx == 0 else pltpu.roll(
                    feat, shift=(-dx) % Wp, axis=1)
                lane_sh.append(jnp.where(col_ok[kx], s, zero))
            # Row (H) shifts: applied once per ky to the kx-combined term.
            for ky in range(K):
                dy = ky - pad
                term = zero
                for kx in range(K):
                    wv = w_ref[c * K * K + ky * K + kx]        # SMEM scalar
                    term = term + wv * lane_sh[kx]
                if dy != 0:
                    term = pltpu.roll(term, shift=(-dy) % Hp, axis=0)
                acc = acc + jnp.where(row_ok[ky], term, zero)

        out = jax.nn.sigmoid(acc + prob_ref[...].astype(jnp.float32))
        o_ref[...] = out.astype(o_ref.dtype)


def bev_geom_attention(x, bev_prob, conv_weight, *,
                       x_block_bytes=8 * 1024 * 1024):
    """x: (N, C, H, W); bev_prob: (N, 1, H, W); conv_weight: (1, 2, K, K)."""
    N, C, H, W = x.shape
    K = conv_weight.shape[-1]
    assert conv_weight.shape == (1, 2, K, K)
    assert bev_prob.shape == (N, 1, H, W)

    # Lane-dense compute/output tile.  x itself is NOT padded (no extra HBM
    # traffic on the dominant read); only tiny bev_prob / out are padded.
    Hp = _round_up(H, 8)
    Wp = _round_up(W, 128)
    prob_p = jnp.pad(bev_prob, ((0, 0), (0, 0), (0, Hp - H), (0, Wp - W)))

    # Flattened weights for SMEM scalar reads: index = c*K*K + ky*K + kx.
    w_flat = conv_weight.reshape(-1).astype(jnp.float32)

    # Channel chunk: largest divisor of C whose (tC, H, W) block fits the
    # per-buffer budget (the pipeline double-buffers it).
    itemsize = jnp.dtype(x.dtype).itemsize
    tC = min(C, max(1, x_block_bytes // max(1, H * W * itemsize)))
    while C % tC:
        tC -= 1
    n_csteps = C // tC

    kernel = functools.partial(_bev_geom_attention_kernel, C=C, H=H, W=W, K=K)

    grid_spec = pltpu.PrefetchScalarGridSpec(
        num_scalar_prefetch=1,                       # conv weights -> SMEM
        grid=(N, n_csteps),                          # reduction axis last
        in_specs=[
            # x: one (tC, H, W) channel chunk per step (batch dim squeezed).
            pl.BlockSpec((None, tC, H, W), lambda n, c, w: (n, c, 0, 0)),
            # bev_prob: (Hp, Wp); re-fetched only when n changes.
            pl.BlockSpec((None, None, Hp, Wp), lambda n, c, w: (n, 0, 0, 0)),
        ],
        out_specs=pl.BlockSpec((None, None, Hp, Wp),
                               lambda n, c, w: (n, 0, 0, 0)),
        scratch_shapes=[
            pltpu.VMEM((Hp, Wp), jnp.float32),       # running channel sum
            pltpu.VMEM((Hp, Wp), jnp.float32),       # running channel max
        ],
    )

    # Explicit VMEM budget: double-buffered blocks + scratch + headroom for
    # the finalize temporaries (the 7 lane-shifted maps per channel may spill).
    hw_pad_f32 = Hp * Wp * 4
    vmem_bytes = (2 * tC * H * W * itemsize                      # x blocks
                  + 2 * Hp * Wp * jnp.dtype(bev_prob.dtype).itemsize
                  + 2 * Hp * Wp * itemsize                       # out blocks
                  + 2 * hw_pad_f32                               # scratch
                  + tC * H * W * 4                               # xc upcast
                  + 48 * hw_pad_f32                              # conv temps
                  + (2 << 20))
    vmem_limit = int(min(max(vmem_bytes, 24 << 20), 64 << 20))

    out_p = pl.pallas_call(
        kernel,
        out_shape=jax.ShapeDtypeStruct((N, 1, Hp, Wp), x.dtype),
        grid_spec=grid_spec,
        compiler_params=pltpu.CompilerParams(
            # batch axis parallel (megacore on v7x); channel axis is a
            # sequential reduction.
            dimension_semantics=("parallel", "arbitrary"),
            vmem_limit_bytes=vmem_limit,
        ),
    )(w_flat, x, prob_p)

    # TODO(synk): for extremely large H*W a spatial tiling with a PAD-wide halo
    # would be needed on top of the channel tiling; not required for BEV sizes.
    return out_p[:, :, :H, :W]


def _reference(x, bev_prob, conv_weight):
    """Pure-JAX reference mirroring the PyTorch forward."""
    avg = jnp.mean(x, axis=1, keepdims=True)
    mx = jnp.max(x, axis=1, keepdims=True)
    x1 = jnp.concatenate([avg, mx], axis=1)              # (N, 2, H, W)
    y = lax.conv_general_dilated(
        x1, conv_weight,
        window_strides=(1, 1),
        padding=[(PAD, PAD), (PAD, PAD)],
        dimension_numbers=("NCHW", "OIHW", "NCHW"),
    )
    return jax.nn.sigmoid(y + bev_prob)


if __name__ == "__main__":
    N, C, H, W = 2, 4, 16, 16

    key = jax.random.PRNGKey(0)
    kx_, kp, kw = jax.random.split(key, 3)

    x = jax.random.normal(kx_, (N, C, H, W), dtype=jnp.float32)
    bev_prob = jax.random.normal(kp, (N, 1, H, W), dtype=jnp.float32)
    # Deterministic synthetic conv weight (PyTorch Conv2d(2, 1, 7) shape).
    conv_weight = 0.05 * jax.random.normal(
        kw, (1, 2, KERNEL_SIZE, KERNEL_SIZE), dtype=jnp.float32)

    out = bev_geom_attention(x, bev_prob, conv_weight)
    out = jax.block_until_ready(out)

    ref = _reference(x, bev_prob, conv_weight)
    np.testing.assert_allclose(np.asarray(out), np.asarray(ref),
                               rtol=1e-5, atol=1e-5)

    print("KERNEL_OK")
</pallas_src>

<mosaic_0001>
module attributes {stable_mosaic.version = 11 : i64} {
  func.func @_bev_geom_attention_kernel(%arg0: i32, %arg1: i32, %arg2: memref<98xf32, #tpu.memory_space<smem>>, %arg3: memref<1x4x16x16xf32, #tpu.memory_space<vmem>>, %arg4: memref<1x1x16x128xf32, #tpu.memory_space<vmem>>, %arg5: memref<1x1x16x128xf32, #tpu.memory_space<vmem>>, %arg6: memref<16x128xf32, #tpu.memory_space<vmem>>, %arg7: memref<16x128xf32, #tpu.memory_space<vmem>>) attributes {dimension_semantics = [#tpu.dimension_semantics<parallel>, #tpu.dimension_semantics<arbitrary>], iteration_bounds = array<i64: 2, 1>, scalar_prefetch = 1 : i64, scratch_operands = 2 : i64, tpu.core_type = #tpu.core_type<tc>, window_params = [{transform_indices = @transform_0, window_bounds = array<i64: 1, 4, 16, 16>}, {transform_indices = @transform_1, window_bounds = array<i64: 1, 1, 16, 128>}, {transform_indices = @transform_2, window_bounds = array<i64: 1, 1, 16, 128>}]} {
    %c0_i32 = arith.constant 0 : i32
    %0 = arith.cmpi eq, %arg1, %c0_i32 : i32
    %1 = arith.extui %0 : i1 to i32
    %c0_i32_0 = arith.constant 0 : i32
    %2 = arith.cmpi ne, %1, %c0_i32_0 : i32
    scf.if %2 {
      %cst_15 = arith.constant 0.000000e+00 : f32
      %16 = vector.broadcast %cst_15 : f32 to vector<16x128xf32>
      %c0_16 = arith.constant 0 : index
      %c0_17 = arith.constant 0 : index
      %17 = vector.load %arg6[%c0_16, %c0_17] : memref<16x128xf32, #tpu.memory_space<vmem>>, vector<16x128xf32>
      tpu.vector_store %arg6[%c0_16, %c0_17], %16 {strides = array<i32>} : memref<16x128xf32, #tpu.memory_space<vmem>>, vector<16x128xf32>,
      %cst_18 = arith.constant 0xFF800000 : f32
      %18 = vector.broadcast %cst_18 : f32 to vector<16x128xf32>
      %c0_19 = arith.constant 0 : index
      %c0_20 = arith.constant 0 : index
      %19 = vector.load %arg7[%c0_19, %c0_20] : memref<16x128xf32, #tpu.memory_space<vmem>>, vector<16x128xf32>
      tpu.vector_store %arg7[%c0_19, %c0_20], %18 {strides = array<i32>} : memref<16x128xf32, #tpu.memory_space<vmem>>, vector<16x128xf32>,
    } else {
    }
    %c0 = arith.constant 0 : index
    %c0_1 = arith.constant 0 : index
    %c0_2 = arith.constant 0 : index
    %c0_3 = arith.constant 0 : index
    %3 = vector.load %arg3[%c0, %c0_1, %c0_2, %c0_3] : memref<1x4x16x16xf32, #tpu.memory_space<vmem>>, vector<1x4x16x16xf32>
    %4 = vector.shape_cast %3 : vector<1x4x16x16xf32> to vector<4x16x16xf32>
    %c0_4 = arith.constant 0 : index
    %c0_5 = arith.constant 0 : index
    %5 = vector.load %arg6[%c0_4, %c0_5] : memref<16x128xf32, #tpu.memory_space<vmem>>, vector<16x16xf32>
    %cst = arith.constant dense<0.000000e+00> : vector<16x16xf32>
    %6 = vector.multi_reduction <add>, %4, %cst [0] : vector<4x16x16xf32> to vector<16x16xf32>
    %7 = arith.addf %5, %6 : vector<16x16xf32>
    %c0_6 = arith.constant 0 : index
    %c0_7 = arith.constant 0 : index
    %8 = vector.load %arg6[%c0_6, %c0_7] : memref<16x128xf32, #tpu.memory_space<vmem>>, vector<16x16xf32>
    tpu.vector_store %arg6[%c0_6, %c0_7], %7 {strides = array<i32>} : memref<16x128xf32, #tpu.memory_space<vmem>>, vector<16x16xf32>,
    %c0_8 = arith.constant 0 : index
    %c0_9 = arith.constant 0 : index
    %9 = vector.load %arg7[%c0_8, %c0_9] : memref<16x128xf32, #tpu.memory_space<vmem>>, vector<16x16xf32>
    %cst_10 = arith.constant dense<0xFF800000> : vector<16x16xf32>
    %10 = vector.multi_reduction <maximumf>, %4, %cst_10 [0] : vector<4x16x16xf32> to vector<16x16xf32>
    %11 = arith.maximumf %9, %10 : vector<16x16xf32>
    %c0_11 = arith.constant 0 : index
    %c0_12 = arith.constant 0 : index
    %12 = vector.load %arg7[%c0_11, %c0_12] : memref<16x128xf32, #tpu.memory_space<vmem>>, vector<16x16xf32>
    tpu.vector_store %arg7[%c0_11, %c0_12], %11 {strides = array<i32>} : memref<16x128xf32, #tpu.memory_space<vmem>>, vector<16x16xf32>,
    %c0_i32_13 = arith.constant 0 : i32
    %13 = arith.cmpi eq, %arg1, %c0_i32_13 : i32
    %14 = arith.extui %13 : i1 to i32
    %c0_i32_14 = arith.constant 0 : i32
    %15 = arith.cmpi ne, %14, %c0_i32_14 : i32
    scf.if %15 {
      %16 = tpu.iota {dimensions = array<i32: 0>} : vector<16x128xi32>
      %17 = tpu.iota {dimensions = array<i32: 1>} : vector<16x128xi32>
      %c16_i32 = arith.constant 16 : i32
      %18 = vector.broadcast %c16_i32 : i32 to vector<16x128xi32>
      %19 = arith.cmpi slt, %16, %18 : vector<16x128xi32>
      %c16_i32_15 = arith.constant 16 : i32
      %20 = vector.broadcast %c16_i32_15 : i32 to vector<16x128xi32>
      %21 = arith.cmpi slt, %17, %20 : vector<16x128xi32>
      %22 = arith.andi %19, %21 : vector<16x128xi1>
      %cst_16 = arith.constant 0.000000e+00 : f32
      %23 = vector.broadcast %cst_16 : f32 to vector<16x128xf32>
      %c0_17 = arith.constant 0 : index
      %c0_18 = arith.constant 0 : index
      %24 = vector.load %arg6[%c0_17, %c0_18] : memref<16x128xf32, #tpu.memory_space<vmem>>, vector<16x128xf32>
      %cst_19 = arith.constant 2.500000e-01 : f32
      %25 = vector.broadcast %cst_19 : f32 to vector<16x128xf32>
      %26 = arith.mulf %24, %25 : vector<16x128xf32>
      %27 = arith.select %22, %26, %23 : vector<16x128xi1>, vector<16x128xf32>
      %c0_20 = arith.constant 0 : index
      %c0_21 = arith.constant 0 : index
      %28 = vector.load %arg7[%c0_20, %c0_21] : memref<16x128xf32, #tpu.memory_space<vmem>>, vector<16x128xf32>
      %29 = arith.select %22, %28, %23 : vector<16x128xi1>, vector<16x128xf32>
      %c-3_i32 = arith.constant -3 : i32
      %30 = vector.broadcast %c-3_i32 : i32 to vector<16x128xi32>
      %31 = arith.addi %17, %30 : vector<16x128xi32>
      %c0_i32_22 = arith.constant 0 : i32
      %32 = vector.broadcast %c0_i32_22 : i32 to vector<16x128xi32>
      %33 = arith.cmpi sge, %31, %32 : vector<16x128xi32>
      %c-3_i32_23 = arith.constant -3 : i32
      %34 = vector.broadcast %c-3_i32_23 : i32 to vector<16x128xi32>
      %35 = arith.addi %17, %34 : vector<16x128xi32>
      %c16_i32_24 = arith.constant 16 : i32
      %36 = vector.broadcast %c16_i32_24 : i32 to vector<16x128xi32>
      %37 = arith.cmpi slt, %35, %36 : vector<16x128xi32>
      %38 = arith.andi %33, %37 : vector<16x128xi1>
      %c-2_i32 = arith.constant -2 : i32
      %39 = vector.broadcast %c-2_i32 : i32 to vector<16x128xi32>
      %40 = arith.addi %17, %39 : vector<16x128xi32>
      %c0_i32_25 = arith.constant 0 : i32
      %41 = vector.broadcast %c0_i32_25 : i32 to vector<16x128xi32>
      %42 = arith.cmpi sge, %40, %41 : vector<16x128xi32>
      %c-2_i32_26 = arith.constant -2 : i32
      %43 = vector.broadcast %c-2_i32_26 : i32 to vector<16x128xi32>
      %44 = arith.addi %17, %43 : vector<16x128xi32>
      %c16_i32_27 = arith.constant 16 : i32
      %45 = vector.broadcast %c16_i32_27 : i32 to vector<16x128xi32>
      %46 = arith.cmpi slt, %44, %45 : vector<16x128xi32>
      %47 = arith.andi %42, %46 : vector<16x128xi1>
      %c-1_i32 = arith.constant -1 : i32
      %48 = vector.broadcast %c-1_i32 : i32 to vector<16x128xi32>
      %49 = arith.addi %17, %48 : vector<16x128xi32>
      %c0_i32_28 = arith.constant 0 : i32
      %50 = vector.broadcast %c0_i32_28 : i32 to vector<16x128xi32>
      %51 = arith.cmpi sge, %49, %50 : vector<16x128xi32>
      %c-1_i32_29 = arith.constant -1 : i32
      %52 = vector.broadcast %c-1_i32_29 : i32 to vector<16x128xi32>
      %53 = arith.addi %17, %52 : vector<16x128xi32>
      %c16_i32_30 = arith.constant 16 : i32
      %54 = vector.broadcast %c16_i32_30 : i32 to vector<16x128xi32>
      %55 = arith.cmpi slt, %53, %54 : vector<16x128xi32>
      %56 = arith.andi %51, %55 : vector<16x128xi1>
      %c0_i32_31 = arith.constant 0 : i32
      %57 = vector.broadcast %c0_i32_31 : i32 to vector<16x128xi32>
      %58 = arith.addi %17, %57 : vector<16x128xi32>
      %c0_i32_32 = arith.constant 0 : i32
      %59 = vector.broadcast %c0_i32_32 : i32 to vector<16x128xi32>
      %60 = arith.cmpi sge, %58, %59 : vector<16x128xi32>
      %c0_i32_33 = arith.constant 0 : i32
      %61 = vector.broadcast %c0_i32_33 : i32 to vector<16x128xi32>
      %62 = arith.addi %17, %61 : vector<16x128xi32>
      %c16_i32_34 = arith.constant 16 : i32
      %63 = vector.broadcast %c16_i32_34 : i32 to vector<16x128xi32>
      %64 = arith.cmpi slt, %62, %63 : vector<16x128xi32>
      %65 = arith.andi %60, %64 : vector<16x128xi1>
      %c1_i32 = arith.constant 1 : i32
      %66 = vector.broadcast %c1_i32 : i32 to vector<16x128xi32>
      %67 = arith.addi %17, %66 : vector<16x128xi32>
      %c0_i32_35 = arith.constant 0 : i32
      %68 = vector.broadcast %c0_i32_35 : i32 to vector<16x128xi32>
      %69 = arith.cmpi sge, %67, %68 : vector<16x128xi32>
      %c1_i32_36 = arith.constant 1 : i32
      %70 = vector.broadcast %c1_i32_36 : i32 to vector<16x128xi32>
      %71 = arith.addi %17, %70 : vector<16x128xi32>
      %c16_i32_37 = arith.constant 16 : i32
      %72 = vector.broadcast %c16_i32_37 : i32 to vector<16x128xi32>
      %73 = arith.cmpi slt, %71, %72 : vector<16x128xi32>
      %74 = arith.andi %69, %73 : vector<16x128xi1>
      %c2_i32 = arith.constant 2 : i32
      %75 = vector.broadcast %c2_i32 : i32 to vector<16x128xi32>
      %76 = arith.addi %17, %75 : vector<16x128xi32>
      %c0_i32_38 = arith.constant 0 : i32
      %77 = vector.broadcast %c0_i32_38 : i32 to vector<16x128xi32>
      %78 = arith.cmpi sge, %76, %77 : vector<16x128xi32>
      %c2_i32_39 = arith.constant 2 : i32
      %79 = vector.broadcast %c2_i32_39 : i32 to vector<16x128xi32>
      %80 = arith.addi %17, %79 : vector<16x128xi32>
      %c16_i32_40 = arith.constant 16 : i32
      %81 = vector.broadcast %c16_i32_40 : i32 to vector<16x128xi32>
      %82 = arith.cmpi slt, %80, %81 : vector<16x128xi32>
      %83 = arith.andi %78, %82 : vector<16x128xi1>
      %c3_i32 = arith.constant 3 : i32
      %84 = vector.broadcast %c3_i32 : i32 to vector<16x128xi32>
      %85 = arith.addi %17, %84 : vector<16x128xi32>
      %c0_i32_41 = arith.constant 0 : i32
      %86 = vector.broadcast %c0_i32_41 : i32 to vector<16x128xi32>
      %87 = arith.cmpi sge, %85, %86 : vector<16x128xi32>
      %c3_i32_42 = arith.constant 3 : i32
      %88 = vector.broadcast %c3_i32_42 : i32 to vector<16x128xi32>
      %89 = arith.addi %17, %88 : vector<16x128xi32>
      %c16_i32_43 = arith.constant 16 : i32
      %90 = vector.broadcast %c16_i32_43 : i32 to vector<16x128xi32>
      %91 = arith.cmpi slt, %89, %90 : vector<16x128xi32>
      %92 = arith.andi %87, %91 : vector<16x128xi1>
      %c-3_i32_44 = arith.constant -3 : i32
      %93 = vector.broadcast %c-3_i32_44 : i32 to vector<16x128xi32>
      %94 = arith.addi %16, %93 : vector<16x128xi32>
      %c0_i32_45 = arith.constant 0 : i32
      %95 = vector.broadcast %c0_i32_45 : i32 to vector<16x128xi32>
      %96 = arith.cmpi sge, %94, %95 : vector<16x128xi32>
      %c-3_i32_46 = arith.constant -3 : i32
      %97 = vector.broadcast %c-3_i32_46 : i32 to vector<16x128xi32>
      %98 = arith.addi %16, %97 : vector<16x128xi32>
      %c16_i32_47 = arith.constant 16 : i32
      %99 = vector.broadcast %c16_i32_47 : i32 to vector<16x128xi32>
      %100 = arith.cmpi slt, %98, %99 : vector<16x128xi32>
      %101 = arith.andi %96, %100 : vector<16x128xi1>
      %c-2_i32_48 = arith.constant -2 : i32
      %102 = vector.broadcast %c-2_i32_48 : i32 to vector<16x128xi32>
      %103 = arith.addi %16, %102 : vector<16x128xi32>
      %c0_i32_49 = arith.constant 0 : i32
      %104 = vector.broadcast %c0_i32_49 : i32 to vector<16x128xi32>
      %105 = arith.cmpi sge, %103, %104 : vector<16x128xi32>
      %c-2_i32_50 = arith.constant -2 : i32
      %106 = vector.broadcast %c-2_i32_50 : i32 to vector<16x128xi32>
      %107 = arith.addi %16, %106 : vector<16x128xi32>
      %c16_i32_51 = arith.constant 16 : i32
      %108 = vector.broadcast %c16_i32_51 : i32 to vector<16x128xi32>
      %109 = arith.cmpi slt, %107, %108 : vector<16x128xi32>
      %110 = arith.andi %105, %109 : vector<16x128xi1>
      %c-1_i32_52 = arith.constant -1 : i32
      %111 = vector.broadcast %c-1_i32_52 : i32 to vector<16x128xi32>
      %112 = arith.addi %16, %111 : vector<16x128xi32>
      %c0_i32_53 = arith.constant 0 : i32
      %113 = vector.broadcast %c0_i32_53 : i32 to vector<16x128xi32>
      %114 = arith.cmpi sge, %112, %113 : vector<16x128xi32>
      %c-1_i32_54 = arith.constant -1 : i32
      %115 = vector.broadcast %c-1_i32_54 : i32 to vector<16x128xi32>
      %116 = arith.addi %16, %115 : vector<16x128xi32>
      %c16_i32_55 = arith.constant 16 : i32
      %117 = vector.broadcast %c16_i32_55 : i32 to vector<16x128xi32>
      %118 = arith.cmpi slt, %116, %117 : vector<16x128xi32>
      %119 = arith.andi %114, %118 : vector<16x128xi1>
      %c0_i32_56 = arith.constant 0 : i32
      %120 = vector.broadcast %c0_i32_56 : i32 to vector<16x128xi32>
      %121 = arith.addi %16, %120 : vector<16x128xi32>
      %c0_i32_57 = arith.constant 0 : i32
      %122 = vector.broadcast %c0_i32_57 : i32 to vector<16x128xi32>
      %123 = arith.cmpi sge, %121, %122 : vector<16x128xi32>
      %c0_i32_58 = arith.constant 0 : i32
      %124 = vector.broadcast %c0_i32_58 : i32 to vector<16x128xi32>
      %125 = arith.addi %16, %124 : vector<16x128xi32>
      %c16_i32_59 = arith.constant 16 : i32
      %126 = vector.broadcast %c16_i32_59 : i32 to vector<16x128xi32>
      %127 = arith.cmpi slt, %125, %126 : vector<16x128xi32>
      %128 = arith.andi %123, %127 : vector<16x128xi1>
      %c1_i32_60 = arith.constant 1 : i32
      %129 = vector.broadcast %c1_i32_60 : i32 to vector<16x128xi32>
      %130 = arith.addi %16, %129 : vector<16x128xi32>
      %c0_i32_61 = arith.constant 0 : i32
      %131 = vector.broadcast %c0_i32_61 : i32 to vector<16x128xi32>
      %132 = arith.cmpi sge, %130, %131 : vector<16x128xi32>
      %c1_i32_62 = arith.constant 1 : i32
      %133 = vector.broadcast %c1_i32_62 : i32 to vector<16x128xi32>
      %134 = arith.addi %16, %133 : vector<16x128xi32>
      %c16_i32_63 = arith.constant 16 : i32
      %135 = vector.broadcast %c16_i32_63 : i32 to vector<16x128xi32>
      %136 = arith.cmpi slt, %134, %135 : vector<16x128xi32>
      %137 = arith.andi %132, %136 : vector<16x128xi1>
      %c2_i32_64 = arith.constant 2 : i32
      %138 = vector.broadcast %c2_i32_64 : i32 to vector<16x128xi32>
      %139 = arith.addi %16, %138 : vector<16x128xi32>
      %c0_i32_65 = arith.constant 0 : i32
      %140 = vector.broadcast %c0_i32_65 : i32 to vector<16x128xi32>
      %141 = arith.cmpi sge, %139, %140 : vector<16x128xi32>
      %c2_i32_66 = arith.constant 2 : i32
      %142 = vector.broadcast %c2_i32_66 : i32 to vector<16x128xi32>
      %143 = arith.addi %16, %142 : vector<16x128xi32>
      %c16_i32_67 = arith.constant 16 : i32
      %144 = vector.broadcast %c16_i32_67 : i32 to vector<16x128xi32>
      %145 = arith.cmpi slt, %143, %144 : vector<16x128xi32>
      %146 = arith.andi %141, %145 : vector<16x128xi1>
      %c3_i32_68 = arith.constant 3 : i32
      %147 = vector.broadcast %c3_i32_68 : i32 to vector<16x128xi32>
      %148 = arith.addi %16, %147 : vector<16x128xi32>
      %c0_i32_69 = arith.constant 0 : i32
      %149 = vector.broadcast %c0_i32_69 : i32 to vector<16x128xi32>
      %150 = arith.cmpi sge, %148, %149 : vector<16x128xi32>
      %c3_i32_70 = arith.constant 3 : i32
      %151 = vector.broadcast %c3_i32_70 : i32 to vector<16x128xi32>
      %152 = arith.addi %16, %151 : vector<16x128xi32>
      %c16_i32_71 = arith.constant 16 : i32
      %153 = vector.broadcast %c16_i32_71 : i32 to vector<16x128xi32>
      %154 = arith.cmpi slt, %152, %153 : vector<16x128xi32>
      %155 = arith.andi %150, %154 : vector<16x128xi1>
      %c3_i32_72 = arith.constant 3 : i32
      %156 = tpu.dynamic_rotate %27 by %c3_i32_72 dim 1 : vector<16x128xf32>, i32 -> vector<16x128xf32>
      %157 = arith.select %38, %156, %23 : vector<16x128xi1>, vector<16x128xf32>
      %c2_i32_73 = arith.constant 2 : i32
      %158 = tpu.dynamic_rotate %27 by %c2_i32_73 dim 1 : vector<16x128xf32>, i32 -> vector<16x128xf32>
      %159 = arith.select %47, %158, %23 : vector<16x128xi1>, vector<16x128xf32>
      %c1_i32_74 = arith.constant 1 : i32
      %160 = tpu.dynamic_rotate %27 by %c1_i32_74 dim 1 : vector<16x128xf32>, i32 -> vector<16x128xf32>
      %161 = arith.select %56, %160, %23 : vector<16x128xi1>, vector<16x128xf32>
      %162 = arith.select %65, %27, %23 : vector<16x128xi1>, vector<16x128xf32>
      %c127_i32 = arith.constant 127 : i32
      %163 = tpu.dynamic_rotate %27 by %c127_i32 dim 1 : vector<16x128xf32>, i32 -> vector<16x128xf32>
      %164 = arith.select %74, %163, %23 : vector<16x128xi1>, vector<16x128xf32>
      %c126_i32 = arith.constant 126 : i32
      %165 = tpu.dynamic_rotate %27 by %c126_i32 dim 1 : vector<16x128xf32>, i32 -> vector<16x128xf32>
      %166 = arith.select %83, %165, %23 : vector<16x128xi1>, vector<16x128xf32>
      %c125_i32 = arith.constant 125 : i32
      %167 = tpu.dynamic_rotate %27 by %c125_i32 dim 1 : vector<16x128xf32>, i32 -> vector<16x128xf32>
      %168 = arith.select %92, %167, %23 : vector<16x128xi1>, vector<16x128xf32>
      %c0_75 = arith.constant 0 : index
      %169 = memref.load %arg2[%c0_75] : memref<98xf32, #tpu.memory_space<smem>>
      %170 = vector.broadcast %169 : f32 to vector<16x128xf32>
      %171 = arith.mulf %170, %157 : vector<16x128xf32>
      %172 = arith.addf %23, %171 : vector<16x128xf32>
      %c1 = arith.constant 1 : index
      %173 = memref.load %arg2[%c1] : memref<98xf32, #tpu.memory_space<smem>>
      %174 = vector.broadcast %173 : f32 to vector<16x128xf32>
      %175 = arith.mulf %174, %159 : vector<16x128xf32>
      %176 = arith.addf %172, %175 : vector<16x128xf32>
      %c2 = arith.constant 2 : index
      %177 = memref.load %arg2[%c2] : memref<98xf32, #tpu.memory_space<smem>>
      %178 = vector.broadcast %177 : f32 to vector<16x128xf32>
      %179 = arith.mulf %178, %161 : vector<16x128xf32>
      %180 = arith.addf %176, %179 : vector<16x128xf32>
      %c3 = arith.constant 3 : index
      %181 = memref.load %arg2[%c3] : memref<98xf32, #tpu.memory_space<smem>>
      %182 = vector.broadcast %181 : f32 to vector<16x128xf32>
      %183 = arith.mulf %182, %162 : vector<16x128xf32>
      %184 = arith.addf %180, %183 : vector<16x128xf32>
      %c4 = arith.constant 4 : index
      %185 = memref.load %arg2[%c4] : memref<98xf32, #tpu.memory_space<smem>>
      %186 = vector.broadcast %185 : f32 to vector<16x128xf32>
      %187 = arith.mulf %186, %164 : vector<16x128xf32>
      %188 = arith.addf %184, %187 : vector<16x128xf32>
      %c5 = arith.constant 5 : index
      %189 = memref.load %arg2[%c5] : memref<98xf32, #tpu.memory_space<smem>>
      %190 = vector.broadcast %189 : f32 to vector<16x128xf32>
      %191 = arith.mulf %190, %166 : vector<16x128xf32>
      %192 = arith.addf %188, %191 : vector<16x128xf32>
      %c6 = arith.constant 6 : index
      %193 = memref.load %arg2[%c6] : memref<98xf32, #tpu.memory_space<smem>>
      %194 = vector.broadcast %193 : f32 to vector<16x128xf32>
      %195 = arith.mulf %194, %168 : vector<16x128xf32>
      %196 = arith.addf %192, %195 : vector<16x128xf32>
      %c3_i32_76 = arith.constant 3 : i32
      %197 = tpu.dynamic_rotate %196 by %c3_i32_76 dim 0 : vector<16x128xf32>, i32 -> vector<16x128xf32>
      %198 = arith.select %101, %197, %23 : vector<16x128xi1>, vector<16x128xf32>
      %199 = arith.addf %23, %198 : vector<16x128xf32>
      %c7 = arith.constant 7 : index
      %200 = memref.load %arg2[%c7] : memref<98xf32, #tpu.memory_space<smem>>
      %201 = vector.broadcast %200 : f32 to vector<16x128xf32>
      %202 = arith.mulf %201, %157 : vector<16x128xf32>
      %203 = arith.addf %23, %202 : vector<16x128xf32>
      %c8 = arith.constant 8 : index
      %204 = memref.load %arg2[%c8] : memref<98xf32, #tpu.memory_space<smem>>
      %205 = vector.broadcast %204 : f32 to vector<16x128xf32>
      %206 = arith.mulf %205, %159 : vector<16x128xf32>
      %207 = arith.addf %203, %206 : vector<16x128xf32>
      %c9 = arith.constant 9 : index
      %208 = memref.load %arg2[%c9] : memref<98xf32, #tpu.memory_space<smem>>
      %209 = vector.broadcast %208 : f32 to vector<16x128xf32>
      %210 = arith.mulf %209, %161 : vector<16x128xf32>
      %211 = arith.addf %207, %210 : vector<16x128xf32>
      %c10 = arith.constant 10 : index
      %212 = memref.load %arg2[%c10] : memref<98xf32, #tpu.memory_space<smem>>
      %213 = vector.broadcast %212 : f32 to vector<16x128xf32>
      %214 = arith.mulf %213, %162 : vector<16x128xf32>
      %215 = arith.addf %211, %214 : vector<16x128xf32>
      %c11 = arith.constant 11 : index
      %216 = memref.load %arg2[%c11] : memref<98xf32, #tpu.memory_space<smem>>
      %217 = vector.broadcast %216 : f32 to vector<16x128xf32>
      %218 = arith.mulf %217, %164 : vector<16x128xf32>
      %219 = arith.addf %215, %218 : vector<16x128xf32>
      %c12 = arith.constant 12 : index
      %220 = memref.load %arg2[%c12] : memref<98xf32, #tpu.memory_space<smem>>
      %221 = vector.broadcast %220 : f32 to vector<16x128xf32>
      %222 = arith.mulf %221, %166 : vector<16x128xf32>
      %223 = arith.addf %219, %222 : vector<16x128xf32>
      %c13 = arith.constant 13 : index
      %224 = memref.load %arg2[%c13] : memref<98xf32, #tpu.memory_space<smem>>
      %225 = vector.broadcast %224 : f32 to vector<16x128xf32>
      %226 = arith.mulf %225, %168 : vector<16x128xf32>
      %227 = arith.addf %223, %226 : vector<16x128xf32>
      %c2_i32_77 = arith.constant 2 : i32
      %228 = tpu.dynamic_rotate %227 by %c2_i32_77 dim 0 : vector<16x128xf32>, i32 -> vector<16x128xf32>
      %229 = arith.select %110, %228, %23 : vector<16x128xi1>, vector<16x128xf32>
      %230 = arith.addf %199, %229 : vector<16x128xf32>
      %c14 = arith.constant 14 : index
      %231 = memref.load %arg2[%c14] : memref<98xf32, #tpu.memory_space<smem>>
      %232 = vector.broadcast %231 : f32 to vector<16x128xf32>
      %233 = arith.mulf %232, %157 : vector<16x128xf32>
      %234 = arith.addf %23, %233 : vector<16x128xf32>
      %c15 = arith.constant 15 : index
      %235 = memref.load %arg2[%c15] : memref<98xf32, #tpu.memory_space<smem>>
      %236 = vector.broadcast %235 : f32 to vector<16x128xf32>
      %237 = arith.mulf %236, %159 : vector<16x128xf32>
      %238 = arith.addf %234, %237 : vector<16x128xf32>
      %c16 = arith.constant 16 : index
      %239 = memref.load %arg2[%c16] : memref<98xf32, #tpu.memory_space<smem>>
      %240 = vector.broadcast %239 : f32 to vector<16x128xf32>
      %241 = arith.mulf %240, %161 : vector<16x128xf32>
      %242 = arith.addf %238, %241 : vector<16x128xf32>
      %c17 = arith.constant 17 : index
      %243 = memref.load %arg2[%c17] : memref<98xf32, #tpu.memory_space<smem>>
      %244 = vector.broadcast %243 : f32 to vector<16x128xf32>
      %245 = arith.mulf %244, %162 : vector<16x128xf32>
      %246 = arith.addf %242, %245 : vector<16x128xf32>
      %c18 = arith.constant 18 : index
      %247 = memref.load %arg2[%c18] : memref<98xf32, #tpu.memory_space<smem>>
      %248 = vector.broadcast %247 : f32 to vector<16x128xf32>
      %249 = arith.mulf %248, %164 : vector<16x128xf32>
      %250 = arith.addf %246, %249 : vector<16x128xf32>
      %c19 = arith.constant 19 : index
      %251 = memref.load %arg2[%c19] : memref<98xf32, #tpu.memory_space<smem>>
      %252 = vector.broadcast %251 : f32 to vector<16x128xf32>
      %253 = arith.mulf %252, %166 : vector<16x128xf32>
      %254 = arith.addf %250, %253 : vector<16x128xf32>
      %c20 = arith.constant 20 : index
      %255 = memref.load %arg2[%c20] : memref<98xf32, #tpu.memory_space<smem>>
      %256 = vector.broadcast %255 : f32 to vector<16x128xf32>
      %257 = arith.mulf %256, %168 : vector<16x128xf32>
      %258 = arith.addf %254, %257 : vector<16x128xf32>
      %c1_i32_78 = arith.constant 1 : i32
      %259 = tpu.dynamic_rotate %258 by %c1_i32_78 dim 0 : vector<16x128xf32>, i32 -> vector<16x128xf32>
      %260 = arith.select %119, %259, %23 : vector<16x128xi1>, vector<16x128xf32>
      %261 = arith.addf %230, %260 : vector<16x128xf32>
      %c21 = arith.constant 21 : index
      %262 = memref.load %arg2[%c21] : memref<98xf32, #tpu.memory_space<smem>>
      %263 = vector.broadcast %262 : f32 to vector<16x128xf32>
      %264 = arith.mulf %263, %157 : vector<16x128xf32>
      %265 = arith.addf %23, %264 : vector<16x128xf32>
      %c22 = arith.constant 22 : index
      %266 = memref.load %arg2[%c22] : memref<98xf32, #tpu.memory_space<smem>>
      %267 = vector.broadcast %266 : f32 to vector<16x128xf32>
      %268 = arith.mulf %267, %159 : vector<16x128xf32>
      %269 = arith.addf %265, %268 : vector<16x128xf32>
      %c23 = arith.constant 23 : index
      %270 = memref.load %arg2[%c23] : memref<98xf32, #tpu.memory_space<smem>>
      %271 = vector.broadcast %270 : f32 to vector<16x128xf32>
      %272 = arith.mulf %271, %161 : vector<16x128xf32>
      %273 = arith.addf %269, %272 : vector<16x128xf32>
      %c24 = arith.constant 24 : index
      %274 = memref.load %arg2[%c24] : memref<98xf32, #tpu.memory_space<smem>>
      %275 = vector.broadcast %274 : f32 to vector<16x128xf32>
      %276 = arith.mulf %275, %162 : vector<16x128xf32>
      %277 = arith.addf %273, %276 : vector<16x128xf32>
      %c25 = arith.constant 25 : index
      %278 = memref.load %arg2[%c25] : memref<98xf32, #tpu.memory_space<smem>>
      %279 = vector.broadcast %278 : f32 to vector<16x128xf32>
      %280 = arith.mulf %279, %164 : vector<16x128xf32>
      %281 = arith.addf %277, %280 : vector<16x128xf32>
      %c26 = arith.constant 26 : index
      %282 = memref.load %arg2[%c26] : memref<98xf32, #tpu.memory_space<smem>>
      %283 = vector.broadcast %282 : f32 to vector<16x128xf32>
      %284 = arith.mulf %283, %166 : vector<16x128xf32>
      %285 = arith.addf %281, %284 : vector<16x128xf32>
      %c27 = arith.constant 27 : index
      %286 = memref.load %arg2[%c27] : memref<98xf32, #tpu.memory_space<smem>>
      %287 = vector.broadcast %286 : f32 to vector<16x128xf32>
      %288 = arith.mulf %287, %168 : vector<16x128xf32>
      %289 = arith.addf %285, %288 : vector<16x128xf32>
      %290 = arith.select %128, %289, %23 : vector<16x128xi1>, vector<16x128xf32>
      %291 = arith.addf %261, %290 : vector<16x128xf32>
      %c28 = arith.constant 28 : index
      %292 = memref.load %arg2[%c28] : memref<98xf32, #tpu.memory_space<smem>>
      %293 = vector.broadcast %292 : f32 to vector<16x128xf32>
      %294 = arith.mulf %293, %157 : vector<16x128xf32>
      %295 = arith.addf %23, %294 : vector<16x128xf32>
      %c29 = arith.constant 29 : index
      %296 = memref.load %arg2[%c29] : memref<98xf32, #tpu.memory_space<smem>>
      %297 = vector.broadcast %296 : f32 to vector<16x128xf32>
      %298 = arith.mulf %297, %159 : vector<16x128xf32>
      %299 = arith.addf %295, %298 : vector<16x128xf32>
      %c30 = arith.constant 30 : index
      %300 = memref.load %arg2[%c30] : memref<98xf32, #tpu.memory_space<smem>>
      %301 = vector.broadcast %300 : f32 to vector<16x128xf32>
      %302 = arith.mulf %301, %161 : vector<16x128xf32>
      %303 = arith.addf %299, %302 : vector<16x128xf32>
      %c31 = arith.constant 31 : index
      %304 = memref.load %arg2[%c31] : memref<98xf32, #tpu.memory_space<smem>>
      %305 = vector.broadcast %304 : f32 to vector<16x128xf32>
      %306 = arith.mulf %305, %162 : vector<16x128xf32>
      %307 = arith.addf %303, %306 : vector<16x128xf32>
      %c32 = arith.constant 32 : index
      %308 = memref.load %arg2[%c32] : memref<98xf32, #tpu.memory_space<smem>>
      %309 = vector.broadcast %308 : f32 to vector<16x128xf32>
      %310 = arith.mulf %309, %164 : vector<16x128xf32>
      %311 = arith.addf %307, %310 : vector<16x128xf32>
      %c33 = arith.constant 33 : index
      %312 = memref.load %arg2[%c33] : memref<98xf32, #tpu.memory_space<smem>>
      %313 = vector.broadcast %312 : f32 to vector<16x128xf32>
      %314 = arith.mulf %313, %166 : vector<16x128xf32>
      %315 = arith.addf %311, %314 : vector<16x128xf32>
      %c34 = arith.constant 34 : index
      %316 = memref.load %arg2[%c34] : memref<98xf32, #tpu.memory_space<smem>>
      %317 = vector.broadcast %316 : f32 to vector<16x128xf32>
      %318 = arith.mulf %317, %168 : vector<16x128xf32>
      %319 = arith.addf %315, %318 : vector<16x128xf32>
      %c15_i32 = arith.constant 15 : i32
      %320 = tpu.dynamic_rotate %319 by %c15_i32 dim 0 : vector<16x128xf32>, i32 -> vector<16x128xf32>
      %321 = arith.select %137, %320, %23 : vector<16x128xi1>, vector<16x128xf32>
      %322 = arith.addf %291, %321 : vector<16x128xf32>
      %c35 = arith.constant 35 : index
      %323 = memref.load %arg2[%c35] : memref<98xf32, #tpu.memory_space<smem>>
      %324 = vector.broadcast %323 : f32 to vector<16x128xf32>
      %325 = arith.mulf %324, %157 : vector<16x128xf32>
      %326 = arith.addf %23, %325 : vector<16x128xf32>
      %c36 = arith.constant 36 : index
      %327 = memref.load %arg2[%c36] : memref<98xf32, #tpu.memory_space<smem>>
      %328 = vector.broadcast %327 : f32 to vector<16x128xf32>
      %329 = arith.mulf %328, %159 : vector<16x128xf32>
      %330 = arith.addf %326, %329 : vector<16x128xf32>
      %c37 = arith.constant 37 : index
      %331 = memref.load %arg2[%c37] : memref<98xf32, #tpu.memory_space<smem>>
      %332 = vector.broadcast %331 : f32 to vector<16x128xf32>
      %333 = arith.mulf %332, %161 : vector<16x128xf32>
      %334 = arith.addf %330, %333 : vector<16x128xf32>
      %c38 = arith.constant 38 : index
      %335 = memref.load %arg2[%c38] : memref<98xf32, #tpu.memory_space<smem>>
      %336 = vector.broadcast %335 : f32 to vector<16x128xf32>
      %337 = arith.mulf %336, %162 : vector<16x128xf32>
      %338 = arith.addf %334, %337 : vector<16x128xf32>
      %c39 = arith.constant 39 : index
      %339 = memref.load %arg2[%c39] : memref<98xf32, #tpu.memory_space<smem>>
      %340 = vector.broadcast %339 : f32 to vector<16x128xf32>
      %341 = arith.mulf %340, %164 : vector<16x128xf32>
      %342 = arith.addf %338, %341 : vector<16x128xf32>
      %c40 = arith.constant 40 : index
      %343 = memref.load %arg2[%c40] : memref<98xf32, #tpu.memory_space<smem>>
      %344 = vector.broadcast %343 : f32 to vector<16x128xf32>
      %345 = arith.mulf %344, %166 : vector<16x128xf32>
      %346 = arith.addf %342, %345 : vector<16x128xf32>
      %c41 = arith.constant 41 : index
      %347 = memref.load %arg2[%c41] : memref<98xf32, #tpu.memory_space<smem>>
      %348 = vector.broadcast %347 : f32 to vector<16x128xf32>
      %349 = arith.mulf %348, %168 : vector<16x128xf32>
      %350 = arith.addf %346, %349 : vector<16x128xf32>
      %c14_i32 = arith.constant 14 : i32
      %351 = tpu.dynamic_rotate %350 by %c14_i32 dim 0 : vector<16x128xf32>, i32 -> vector<16x128xf32>
      %352 = arith.select %146, %351, %23 : vector<16x128xi1>, vector<16x128xf32>
      %353 = arith.addf %322, %352 : vector<16x128xf32>
      %c42 = arith.constant 42 : index
      %354 = memref.load %arg2[%c42] : memref<98xf32, #tpu.memory_space<smem>>
      %355 = vector.broadcast %354 : f32 to vector<16x128xf32>
      %356 = arith.mulf %355, %157 : vector<16x128xf32>
      %357 = arith.addf %23, %356 : vector<16x128xf32>
      %c43 = arith.constant 43 : index
      %358 = memref.load %arg2[%c43] : memref<98xf32, #tpu.memory_space<smem>>
      %359 = vector.broadcast %358 : f32 to vector<16x128xf32>
      %360 = arith.mulf %359, %159 : vector<16x128xf32>
      %361 = arith.addf %357, %360 : vector<16x128xf32>
      %c44 = arith.constant 44 : index
      %362 = memref.load %arg2[%c44] : memref<98xf32, #tpu.memory_space<smem>>
      %363 = vector.broadcast %362 : f32 to vector<16x128xf32>
      %364 = arith.mulf %363, %161 : vector<16x128xf32>
      %365 = arith.addf %361, %364 : vector<16x128xf32>
      %c45 = arith.constant 45 : index
      %366 = memref.load %arg2[%c45] : memref<98xf32, #tpu.memory_space<smem>>
      %367 = vector.broadcast %366 : f32 to vector<16x128xf32>
      %368 = arith.mulf %367, %162 : vector<16x128xf32>
      %369 = arith.addf %365, %368 : vector<16x128xf32>
      %c46 = arith.constant 46 : index
      %370 = memref.load %arg2[%c46] : memref<98xf32, #tpu.memory_space<smem>>
      %371 = vector.broadcast %370 : f32 to vector<16x128xf32>
      %372 = arith.mulf %371, %164 : vector<16x128xf32>
      %373 = arith.addf %369, %372 : vector<16x128xf32>
      %c47 = arith.constant 47 : index
      %374 = memref.load %arg2[%c47] : memref<98xf32, #tpu.memory_space<smem>>
      %375 = vector.broadcast %374 : f32 to vector<16x128xf32>
      %376 = arith.mulf %375, %166 : vector<16x128xf32>
      %377 = arith.addf %373, %376 : vector<16x128xf32>
      %c48 = arith.constant 48 : index
      %378 = memref.load %arg2[%c48] : memref<98xf32, #tpu.memory_space<smem>>
      %379 = vector.broadcast %378 : f32 to vector<16x128xf32>
      %380 = arith.mulf %379, %168 : vector<16x128xf32>
      %381 = arith.addf %377, %380 : vector<16x128xf32>
      %c13_i32 = arith.constant 13 : i32
      %382 = tpu.dynamic_rotate %381 by %c13_i32 dim 0 : vector<16x128xf32>, i32 -> vector<16x128xf32>
      %383 = arith.select %155, %382, %23 : vector<16x128xi1>, vector<16x128xf32>
      %384 = arith.addf %353, %383 : vector<16x128xf32>
      %c3_i32_79 = arith.constant 3 : i32
      %385 = tpu.dynamic_rotate %29 by %c3_i32_79 dim 1 : vector<16x128xf32>, i32 -> vector<16x128xf32>
      %386 = arith.select %38, %385, %23 : vector<16x128xi1>, vector<16x128xf32>
      %c2_i32_80 = arith.constant 2 : i32
      %387 = tpu.dynamic_rotate %29 by %c2_i32_80 dim 1 : vector<16x128xf32>, i32 -> vector<16x128xf32>
      %388 = arith.select %47, %387, %23 : vector<16x128xi1>, vector<16x128xf32>
      %c1_i32_81 = arith.constant 1 : i32
      %389 = tpu.dynamic_rotate %29 by %c1_i32_81 dim 1 : vector<16x128xf32>, i32 -> vector<16x128xf32>
      %390 = arith.select %56, %389, %23 : vector<16x128xi1>, vector<16x128xf32>
      %391 = arith.select %65, %29, %23 : vector<16x128xi1>, vector<16x128xf32>
      %c127_i32_82 = arith.constant 127 : i32
      %392 = tpu.dynamic_rotate %29 by %c127_i32_82 dim 1 : vector<16x128xf32>, i32 -> vector<16x128xf32>
      %393 = arith.select %74, %392, %23 : vector<16x128xi1>, vector<16x128xf32>
      %c126_i32_83 = arith.constant 126 : i32
      %394 = tpu.dynamic_rotate %29 by %c126_i32_83 dim 1 : vector<16x128xf32>, i32 -> vector<16x128xf32>
      %395 = arith.select %83, %394, %23 : vector<16x128xi1>, vector<16x128xf32>
      %c125_i32_84 = arith.constant 125 : i32
      %396 = tpu.dynamic_rotate %29 by %c125_i32_84 dim 1 : vector<16x128xf32>, i32 -> vector<16x128xf32>
      %397 = arith.select %92, %396, %23 : vector<16x128xi1>, vector<16x128xf32>
      %c49 = arith.constant 49 : index
      %398 = memref.load %arg2[%c49] : memref<98xf32, #tpu.memory_space<smem>>
      %399 = vector.broadcast %398 : f32 to vector<16x128xf32>
      %400 = arith.mulf %399, %386 : vector<16x128xf32>
      %401 = arith.addf %23, %400 : vector<16x128xf32>
      %c50 = arith.constant 50 : index
      %402 = memref.load %arg2[%c50] : memref<98xf32, #tpu.memory_space<smem>>
      %403 = vector.broadcast %402 : f32 to vector<16x128xf32>
      %404 = arith.mulf %403, %388 : vector<16x128xf32>
      %405 = arith.addf %401, %404 : vector<16x128xf32>
      %c51 = arith.constant 51 : index
      %406 = memref.load %arg2[%c51] : memref<98xf32, #tpu.memory_space<smem>>
      %407 = vector.broadcast %406 : f32 to vector<16x128xf32>
      %408 = arith.mulf %407, %390 : vector<16x128xf32>
      %409 = arith.addf %405, %408 : vector<16x128xf32>
      %c52 = arith.constant 52 : index
      %410 = memref.load %arg2[%c52] : memref<98xf32, #tpu.memory_space<smem>>
      %411 = vector.broadcast %410 : f32 to vector<16x128xf32>
      %412 = arith.mulf %411, %391 : vector<16x128xf32>
      %413 = arith.addf %409, %412 : vector<16x128xf32>
      %c53 = arith.constant 53 : index
      %414 = memref.load %arg2[%c53] : memref<98xf32, #tpu.memory_space<smem>>
      %415 = vector.broadcast %414 : f32 to vector<16x128xf32>
      %416 = arith.mulf %415, %393 : vector<16x128xf32>
      %417 = arith.addf %413, %416 : vector<16x128xf32>
      %c54 = arith.constant 54 : index
      %418 = memref.load %arg2[%c54] : memref<98xf32, #tpu.memory_space<smem>>
      %419 = vector.broadcast %418 : f32 to vector<16x128xf32>
      %420 = arith.mulf %419, %395 : vector<16x128xf32>
      %421 = arith.addf %417, %420 : vector<16x128xf32>
      %c55 = arith.constant 55 : index
      %422 = memref.load %arg2[%c55] : memref<98xf32, #tpu.memory_space<smem>>
      %423 = vector.broadcast %422 : f32 to vector<16x128xf32>
      %424 = arith.mulf %423, %397 : vector<16x128xf32>
      %425 = arith.addf %421, %424 : vector<16x128xf32>
      %c3_i32_85 = arith.constant 3 : i32
      %426 = tpu.dynamic_rotate %425 by %c3_i32_85 dim 0 : vector<16x128xf32>, i32 -> vector<16x128xf32>
      %427 = arith.select %101, %426, %23 : vector<16x128xi1>, vector<16x128xf32>
      %428 = arith.addf %384, %427 : vector<16x128xf32>
      %c56 = arith.constant 56 : index
      %429 = memref.load %arg2[%c56] : memref<98xf32, #tpu.memory_space<smem>>
      %430 = vector.broadcast %429 : f32 to vector<16x128xf32>
      %431 = arith.mulf %430, %386 : vector<16x128xf32>
      %432 = arith.addf %23, %431 : vector<16x128xf32>
      %c57 = arith.constant 57 : index
      %433 = memref.load %arg2[%c57] : memref<98xf32, #tpu.memory_space<smem>>
      %434 = vector.broadcast %433 : f32 to vector<16x128xf32>
      %435 = arith.mulf %434, %388 : vector<16x128xf32>
      %436 = arith.addf %432, %435 : vector<16x128xf32>
      %c58 = arith.constant 58 : index
      %437 = memref.load %arg2[%c58] : memref<98xf32, #tpu.memory_space<smem>>
      %438 = vector.broadcast %437 : f32 to vector<16x128xf32>
      %439 = arith.mulf %438, %390 : vector<16x128xf32>
      %440 = arith.addf %436, %439 : vector<16x128xf32>
      %c59 = arith.constant 59 : index
      %441 = memref.load %arg2[%c59] : memref<98xf32, #tpu.memory_space<smem>>
      %442 = vector.broadcast %441 : f32 to vector<16x128xf32>
      %443 = arith.mulf %442, %391 : vector<16x128xf32>
      %444 = arith.addf %440, %443 : vector<16x128xf32>
      %c60 = arith.constant 60 : index
      %445 = memref.load %arg2[%c60] : memref<98xf32, #tpu.memory_space<smem>>
      %446 = vector.broadcast %445 : f32 to vector<16x128xf32>
      %447 = arith.mulf %446, %393 : vector<16x128xf32>
      %448 = arith.addf %444, %447 : vector<16x128xf32>
      %c61 = arith.constant 61 : index
      %449 = memref.load %arg2[%c61] : memref<98xf32, #tpu.memory_space<smem>>
      %450 = vector.broadcast %449 : f32 to vector<16x128xf32>
      %451 = arith.mulf %450, %395 : vector<16x128xf32>
      %452 = arith.addf %448, %451 : vector<16x128xf32>
      %c62 = arith.constant 62 : index
      %453 = memref.load %arg2[%c62] : memref<98xf32, #tpu.memory_space<smem>>
      %454 = vector.broadcast %453 : f32 to vector<16x128xf32>
      %455 = arith.mulf %454, %397 : vector<16x128xf32>
      %456 = arith.addf %452, %455 : vector<16x128xf32>
      %c2_i32_86 = arith.constant 2 : i32
      %457 = tpu.dynamic_rotate %456 by %c2_i32_86 dim 0 : vector<16x128xf32>, i32 -> vector<16x128xf32>
      %458 = arith.select %110, %457, %23 : vector<16x128xi1>, vector<16x128xf32>
      %459 = arith.addf %428, %458 : vector<16x128xf32>
      %c63 = arith.constant 63 : index
      %460 = memref.load %arg2[%c63] : memref<98xf32, #tpu.memory_space<smem>>
      %461 = vector.broadcast %460 : f32 to vector<16x128xf32>
      %462 = arith.mulf %461, %386 : vector<16x128xf32>
      %463 = arith.addf %23, %462 : vector<16x128xf32>
      %c64 = arith.constant 64 : index
      %464 = memref.load %arg2[%c64] : memref<98xf32, #tpu.memory_space<smem>>
      %465 = vector.broadcast %464 : f32 to vector<16x128xf32>
      %466 = arith.mulf %465, %388 : vector<16x128xf32>
      %467 = arith.addf %463, %466 : vector<16x128xf32>
      %c65 = arith.constant 65 : index
      %468 = memref.load %arg2[%c65] : memref<98xf32, #tpu.memory_space<smem>>
      %469 = vector.broadcast %468 : f32 to vector<16x128xf32>
      %470 = arith.mulf %469, %390 : vector<16x128xf32>
      %471 = arith.addf %467, %470 : vector<16x128xf32>
      %c66 = arith.constant 66 : index
      %472 = memref.load %arg2[%c66] : memref<98xf32, #tpu.memory_space<smem>>
      %473 = vector.broadcast %472 : f32 to vector<16x128xf32>
      %474 = arith.mulf %473, %391 : vector<16x128xf32>
      %475 = arith.addf %471, %474 : vector<16x128xf32>
      %c67 = arith.constant 67 : index
      %476 = memref.load %arg2[%c67] : memref<98xf32, #tpu.memory_space<smem>>
      %477 = vector.broadcast %476 : f32 to vector<16x128xf32>
      %478 = arith.mulf %477, %393 : vector<16x128xf32>
      %479 = arith.addf %475, %478 : vector<16x128xf32>
      %c68 = arith.constant 68 : index
      %480 = memref.load %arg2[%c68] : memref<98xf32, #tpu.memory_space<smem>>
      %481 = vector.broadcast %480 : f32 to vector<16x128xf32>
      %482 = arith.mulf %481, %395 : vector<16x128xf32>
      %483 = arith.addf %479, %482 : vector<16x128xf32>
      %c69 = arith.constant 69 : index
      %484 = memref.load %arg2[%c69] : memref<98xf32, #tpu.memory_space<smem>>
      %485 = vector.broadcast %484 : f32 to vector<16x128xf32>
      %486 = arith.mulf %485, %397 : vector<16x128xf32>
      %487 = arith.addf %483, %486 : vector<16x128xf32>
      %c1_i32_87 = arith.constant 1 : i32
      %488 = tpu.dynamic_rotate %487 by %c1_i32_87 dim 0 : vector<16x128xf32>, i32 -> vector<16x128xf32>
      %489 = arith.select %119, %488, %23 : vector<16x128xi1>, vector<16x128xf32>
      %490 = arith.addf %459, %489 : vector<16x128xf32>
      %c70 = arith.constant 70 : index
      %491 = memref.load %arg2[%c70] : memref<98xf32, #tpu.memory_space<smem>>
      %492 = vector.broadcast %491 : f32 to vector<16x128xf32>
      %493 = arith.mulf %492, %386 : vector<16x128xf32>
      %494 = arith.addf %23, %493 : vector<16x128xf32>
      %c71 = arith.constant 71 : index
      %495 = memref.load %arg2[%c71] : memref<98xf32, #tpu.memory_space<smem>>
      %496 = vector.broadcast %495 : f32 to vector<16x128xf32>
      %497 = arith.mulf %496, %388 : vector<16x128xf32>
      %498 = arith.addf %494, %497 : vector<16x128xf32>
      %c72 = arith.constant 72 : index
      %499 = memref.load %arg2[%c72] : memref<98xf32, #tpu.memory_space<smem>>
      %500 = vector.broadcast %499 : f32 to vector<16x128xf32>
      %501 = arith.mulf %500, %390 : vector<16x128xf32>
      %502 = arith.addf %498, %501 : vector<16x128xf32>
      %c73 = arith.constant 73 : index
      %503 = memref.load %arg2[%c73] : memref<98xf32, #tpu.memory_space<smem>>
      %504 = vector.broadcast %503 : f32 to vector<16x128xf32>
      %505 = arith.mulf %504, %391 : vector<16x128xf32>
      %506 = arith.addf %502, %505 : vector<16x128xf32>
      %c74 = arith.constant 74 : index
      %507 = memref.load %arg2[%c74] : memref<98xf32, #tpu.memory_space<smem>>
      %508 = vector.broadcast %507 : f32 to vector<16x128xf32>
      %509 = arith.mulf %508, %393 : vector<16x128xf32>
      %510 = arith.addf %506, %509 : vector<16x128xf32>
      %c75 = arith.constant 75 : index
      %511 = memref.load %arg2[%c75] : memref<98xf32, #tpu.memory_space<smem>>
      %512 = vector.broadcast %511 : f32 to vector<16x128xf32>
      %513 = arith.mulf %512, %395 : vector<16x128xf32>
      %514 = arith.addf %510, %513 : vector<16x128xf32>
      %c76 = arith.constant 76 : index
      %515 = memref.load %arg2[%c76] : memref<98xf32, #tpu.memory_space<smem>>
      %516 = vector.broadcast %515 : f32 to vector<16x128xf32>
      %517 = arith.mulf %516, %397 : vector<16x128xf32>
      %518 = arith.addf %514, %517 : vector<16x128xf32>
      %519 = arith.select %128, %518, %23 : vector<16x128xi1>, vector<16x128xf32>
      %520 = arith.addf %490, %519 : vector<16x128xf32>
      %c77 = arith.constant 77 : index
      %521 = memref.load %arg2[%c77] : memref<98xf32, #tpu.memory_space<smem>>
      %522 = vector.broadcast %521 : f32 to vector<16x128xf32>
      %523 = arith.mulf %522, %386 : vector<16x128xf32>
      %524 = arith.addf %23, %523 : vector<16x128xf32>
      %c78 = arith.constant 78 : index
      %525 = memref.load %arg2[%c78] : memref<98xf32, #tpu.memory_space<smem>>
      %526 = vector.broadcast %525 : f32 to vector<16x128xf32>
      %527 = arith.mulf %526, %388 : vector<16x128xf32>
      %528 = arith.addf %524, %527 : vector<16x128xf32>
      %c79 = arith.constant 79 : index
      %529 = memref.load %arg2[%c79] : memref<98xf32, #tpu.memory_space<smem>>
      %530 = vector.broadcast %529 : f32 to vector<16x128xf32>
      %531 = arith.mulf %530, %390 : vector<16x128xf32>
      %532 = arith.addf %528, %531 : vector<16x128xf32>
      %c80 = arith.constant 80 : index
      %533 = memref.load %arg2[%c80] : memref<98xf32, #tpu.memory_space<smem>>
      %534 = vector.broadcast %533 : f32 to vector<16x128xf32>
      %535 = arith.mulf %534, %391 : vector<16x128xf32>
      %536 = arith.addf %532, %535 : vector<16x128xf32>
      %c81 = arith.constant 81 : index
      %537 = memref.load %arg2[%c81] : memref<98xf32, #tpu.memory_space<smem>>
      %538 = vector.broadcast %537 : f32 to vector<16x128xf32>
      %539 = arith.mulf %538, %393 : vector<16x128xf32>
      %540 = arith.addf %536, %539 : vector<16x128xf32>
      %c82 = arith.constant 82 : index
      %541 = memref.load %arg2[%c82] : memref<98xf32, #tpu.memory_space<smem>>
      %542 = vector.broadcast %541 : f32 to vector<16x128xf32>
      %543 = arith.mulf %542, %395 : vector<16x128xf32>
      %544 = arith.addf %540, %543 : vector<16x128xf32>
      %c83 = arith.constant 83 : index
      %545 = memref.load %arg2[%c83] : memref<98xf32, #tpu.memory_space<smem>>
      %546 = vector.broadcast %545 : f32 to vector<16x128xf32>
      %547 = arith.mulf %546, %397 : vector<16x128xf32>
      %548 = arith.addf %544, %547 : vector<16x128xf32>
      %c15_i32_88 = arith.constant 15 : i32
      %549 = tpu.dynamic_rotate %548 by %c15_i32_88 dim 0 : vector<16x128xf32>, i32 -> vector<16x128xf32>
      %550 = arith.select %137, %549, %23 : vector<16x128xi1>, vector<16x128xf32>
      %551 = arith.addf %520, %550 : vector<16x128xf32>
      %c84 = arith.constant 84 : index
      %552 = memref.load %arg2[%c84] : memref<98xf32, #tpu.memory_space<smem>>
      %553 = vector.broadcast %552 : f32 to vector<16x128xf32>
      %554 = arith.mulf %553, %386 : vector<16x128xf32>
      %555 = arith.addf %23, %554 : vector<16x128xf32>
      %c85 = arith.constant 85 : index
      %556 = memref.load %arg2[%c85] : memref<98xf32, #tpu.memory_space<smem>>
      %557 = vector.broadcast %556 : f32 to vector<16x128xf32>
      %558 = arith.mulf %557, %388 : vector<16x128xf32>
      %559 = arith.addf %555, %558 : vector<16x128xf32>
      %c86 = arith.constant 86 : index
      %560 = memref.load %arg2[%c86] : memref<98xf32, #tpu.memory_space<smem>>
      %561 = vector.broadcast %560 : f32 to vector<16x128xf32>
      %562 = arith.mulf %561, %390 : vector<16x128xf32>
      %563 = arith.addf %559, %562 : vector<16x128xf32>
      %c87 = arith.constant 87 : index
      %564 = memref.load %arg2[%c87] : memref<98xf32, #tpu.memory_space<smem>>
      %565 = vector.broadcast %564 : f32 to vector<16x128xf32>
      %566 = arith.mulf %565, %391 : vector<16x128xf32>
      %567 = arith.addf %563, %566 : vector<16x128xf32>
      %c88 = arith.constant 88 : index
      %568 = memref.load %arg2[%c88] : memref<98xf32, #tpu.memory_space<smem>>
      %569 = vector.broadcast %568 : f32 to vector<16x128xf32>
      %570 = arith.mulf %569, %393 : vector<16x128xf32>
      %571 = arith.addf %567, %570 : vector<16x128xf32>
      %c89 = arith.constant 89 : index
      %572 = memref.load %arg2[%c89] : memref<98xf32, #tpu.memory_space<smem>>
      %573 = vector.broadcast %572 : f32 to vector<16x128xf32>
      %574 = arith.mulf %573, %395 : vector<16x128xf32>
      %575 = arith.addf %571, %574 : vector<16x128xf32>
      %c90 = arith.constant 90 : index
      %576 = memref.load %arg2[%c90] : memref<98xf32, #tpu.memory_space<smem>>
      %577 = vector.broadcast %576 : f32 to vector<16x128xf32>
      %578 = arith.mulf %577, %397 : vector<16x128xf32>
      %579 = arith.addf %575, %578 : vector<16x128xf32>
      %c14_i32_89 = arith.constant 14 : i32
      %580 = tpu.dynamic_rotate %579 by %c14_i32_89 dim 0 : vector<16x128xf32>, i32 -> vector<16x128xf32>
      %581 = arith.select %146, %580, %23 : vector<16x128xi1>, vector<16x128xf32>
      %582 = arith.addf %551, %581 : vector<16x128xf32>
      %c91 = arith.constant 91 : index
      %583 = memref.load %arg2[%c91] : memref<98xf32, #tpu.memory_space<smem>>
      %584 = vector.broadcast %583 : f32 to vector<16x128xf32>
      %585 = arith.mulf %584, %386 : vector<16x128xf32>
      %586 = arith.addf %23, %585 : vector<16x128xf32>
      %c92 = arith.constant 92 : index
      %587 = memref.load %arg2[%c92] : memref<98xf32, #tpu.memory_space<smem>>
      %588 = vector.broadcast %587 : f32 to vector<16x128xf32>
      %589 = arith.mulf %588, %388 : vector<16x128xf32>
      %590 = arith.addf %586, %589 : vector<16x128xf32>
      %c93 = arith.constant 93 : index
      %591 = memref.load %arg2[%c93] : memref<98xf32, #tpu.memory_space<smem>>
      %592 = vector.broadcast %591 : f32 to vector<16x128xf32>
      %593 = arith.mulf %592, %390 : vector<16x128xf32>
      %594 = arith.addf %590, %593 : vector<16x128xf32>
      %c94 = arith.constant 94 : index
      %595 = memref.load %arg2[%c94] : memref<98xf32, #tpu.memory_space<smem>>
      %596 = vector.broadcast %595 : f32 to vector<16x128xf32>
      %597 = arith.mulf %596, %391 : vector<16x128xf32>
      %598 = arith.addf %594, %597 : vector<16x128xf32>
      %c95 = arith.constant 95 : index
      %599 = memref.load %arg2[%c95] : memref<98xf32, #tpu.memory_space<smem>>
      %600 = vector.broadcast %599 : f32 to vector<16x128xf32>
      %601 = arith.mulf %600, %393 : vector<16x128xf32>
      %602 = arith.addf %598, %601 : vector<16x128xf32>
      %c96 = arith.constant 96 : index
      %603 = memref.load %arg2[%c96] : memref<98xf32, #tpu.memory_space<smem>>
      %604 = vector.broadcast %603 : f32 to vector<16x128xf32>
      %605 = arith.mulf %604, %395 : vector<16x128xf32>
      %606 = arith.addf %602, %605 : vector<16x128xf32>
      %c97 = arith.constant 97 : index
      %607 = memref.load %arg2[%c97] : memref<98xf32, #tpu.memory_space<smem>>
      %608 = vector.broadcast %607 : f32 to vector<16x128xf32>
      %609 = arith.mulf %608, %397 : vector<16x128xf32>
      %610 = arith.addf %606, %609 : vector<16x128xf32>
      %c13_i32_90 = arith.constant 13 : i32
      %611 = tpu.dynamic_rotate %610 by %c13_i32_90 dim 0 : vector<16x128xf32>, i32 -> vector<16x128xf32>
      %612 = arith.select %155, %611, %23 : vector<16x128xi1>, vector<16x128xf32>
      %613 = arith.addf %582, %612 : vector<16x128xf32>
      %c0_91 = arith.constant 0 : index
      %c0_92 = arith.constant 0 : index
      %c0_93 = arith.constant 0 : index
      %c0_94 = arith.constant 0 : index
      %614 = vector.load %arg4[%c0_91, %c0_92, %c0_93, %c0_94] : memref<1x1x16x128xf32, #tpu.memory_space<vmem>>, vector<1x1x16x128xf32>
      %615 = vector.shape_cast %614 : vector<1x1x16x128xf32> to vector<16x128xf32>
      %616 = arith.addf %613, %615 : vector<16x128xf32>
      %617 = arith.negf %616 : vector<16x128xf32>
      %618 = math.exp %617 : vector<16x128xf32>
      %cst_95 = arith.constant 1.000000e+00 : f32
      %619 = vector.broadcast %cst_95 : f32 to vector<16x128xf32>
      %620 = arith.addf %619, %618 : vector<16x128xf32>
      %621 = arith.divf %619, %620 : vector<16x128xf32>
      %c0_96 = arith.constant 0 : index
      %c0_97 = arith.constant 0 : index
      %c0_98 = arith.constant 0 : index
      %c0_99 = arith.constant 0 : index
      %622 = vector.load %arg5[%c0_96, %c0_97, %c0_98, %c0_99] : memref<1x1x16x128xf32, #tpu.memory_space<vmem>>, vector<1x1x16x128xf32>
      %623 = vector.shape_cast %622 : vector<1x1x16x128xf32> to vector<16x128xf32>
      %624 = vector.shape_cast %621 : vector<16x128xf32> to vector<1x1x16x128xf32>
      tpu.vector_store %arg5[%c0_96, %c0_97, %c0_98, %c0_99], %624 {strides = array<i32>} : memref<1x1x16x128xf32, #tpu.memory_space<vmem>>, vector<1x1x16x128xf32>,
    } else {
    }
    return
  }
  func.func @transform_0(%arg0: i32, %arg1: i32, %arg2: memref<98xf32, #tpu.memory_space<smem>>) -> (i32, i32, i32, i32) {
    %c0_i32 = arith.constant 0 : i32
    %c0_i32_0 = arith.constant 0 : i32
    %c0_i32_1 = arith.constant 0 : i32
    return %arg0, %arg1, %c0_i32, %c0_i32_0 : i32, i32, i32, i32
  }
  func.func @transform_1(%arg0: i32, %arg1: i32, %arg2: memref<98xf32, #tpu.memory_space<smem>>) -> (i32, i32, i32, i32) {
    %c0_i32 = arith.constant 0 : i32
    %c0_i32_0 = arith.constant 0 : i32
    %c0_i32_1 = arith.constant 0 : i32
    %c0_i32_2 = arith.constant 0 : i32
    return %arg0, %c0_i32, %c0_i32_0, %c0_i32_1 : i32, i32, i32, i32
  }
  func.func @transform_2(%arg0: i32, %arg1: i32, %arg2: memref<98xf32, #tpu.memory_space<smem>>) -> (i32, i32, i32, i32) {
    %c0_i32 = arith.constant 0 : i32
    %c0_i32_0 = arith.constant 0 : i32
    %c0_i32_1 = arith.constant 0 : i32
    %c0_i32_2 = arith.constant 0 : i32
    return %arg0, %c0_i32, %c0_i32_0, %c0_i32_1 : i32, i32, i32, i32
  }
}

</mosaic_0001>

<bundles_post_ra>
// kernel: tpu_custom_call.1
= control target key start
LH: loop header
LB: loop body
LE: loop exit
PB: predicated region body
PF: predicated region fallthrough
CT: control target
= control target key end

     0   :  { %s1703_s15 = smov [#allocation5]   ;;  %s3023_s0 = inlined_call_operand.hbm [shape: f32[98], index: 0, kind: input, shape index: {}]   ;;  %s3024_s1 = inlined_call_operand.hbm [shape: f32[2,4,16,16], index: 1, kind: input, shape index: {}]   ;;  %s3025_s2 = inlined_call_operand.hbm [shape: f32[2,1,16,128], index: 2, kind: input, shape index: {}]   ;;  %s3026_s3 = inlined_call_operand.hbm [shape: f32[2,1,16,128], index: 3, kind: output, shape index: {}]  }
   0x1   :  { %3089 = sst [smem:[#allocation53_spill]] %s3024_s1  ;;  %s9_s14 = sshll.u32 %s3023_s0, 4  ;;  %s10_s14 = int_to_ptr.hbm [resolvable:$true] %s9_s14 }
   0x2   :  { %3090 = sst [smem:[#allocation54_spill]] %s3025_s2 }
   0x3   :  { %3091 = sst [smem:[#allocation55_spill]] %s3026_s3 }
   0x4   :  { %12 = dma.hbm_to_smem %s10_s14, 16, %s1703_s15, [#allocation4] }
   0x5   :  { %1665 = dma.done.wait [#allocation4], 16 }
   0x6   :  { %1666 = vsyncadd [#allocation4], 4294967280 }
   0x7   :  { %15 = sfence }
   0x8   :  { %16 = vsyncpa [#allocation7], 0 }
   0x9   :  { %18 = vsyncpa [#allocation7 + $0x1], 0 }
   0xa   :  { %19 = vsyncpa [#allocation10], 0 }
   0xb   :  { %21 = vsyncpa [#allocation10 + $0x1], 0 }
   0xc   :  { %22 = vsyncpa [#allocation8], 0 }
   0xd   :  { %24 = vsyncpa [#allocation8 + $0x1], 0  ;;  %s1739_s16 = smov 0   ;;  %s1741_s17 = smov 0  }
   0xe   :  { %s1743_s18 = smov 0   ;;  %s1745_s19 = smov 0  }
   0xf   :  { %s1747_s0 = smov 0   ;;  %s1749_s20 = smov 0  }
  0x10 LB: > { %3092 = sst [smem:[#allocation16_spill]] %s1681_s16  ;;  %s1332_s21 = sadd.s32 4294967295, %s1701_s20   ;;  %s1701_s20 = sphi %s1749_s20, %s30_s20   ;;  %s1697_s0 = sphi %s1747_s0, %s3236_s0   ;;  %s1693_s19 = sphi %s1745_s19, %s3235_s19   ;;  %s1689_s18 = sphi %s1743_s18, %s3234_s18   ;;  %s1685_s17 = sphi %s1741_s17, %s3233_s17   ;;  %s1681_s16 = sphi %s1739_s16, %s3232_s16  }
  0x11   : > { %3093 = sst [smem:[#allocation17_spill]] %s1685_s17  ;;  %s1333_s22 = sadd.s32 4294967294, %s1701_s20  }
  0x12   : > { %3094 = sst [smem:[#allocation18_spill]] %s1689_s18  ;;  %s42_s23 = sadd.s32 1, %s1697_s0 }
  0x13   : > { %3095 = sst [smem:[#allocation19_spill]] %s1693_s19  ;;  %s51_s24 = sadd.s32 1, %s1689_s18 }
  0x14   : > { %3096 = sst [smem:[#allocation20_spill]] %s1697_s0  ;;  %p44_p0 = scmp.ge.s32.totalorder %s42_s23, 2 }
  0x15   : > { %3097 = sst [smem:[#allocation21_spill]] %s1701_s20  ;;  %p58_p1 = scmp.ne.s32.totalorder %s1689_s18, %s1685_s17 }
  0x16   : > { %p59_p2 = scmp.eq.s32.totalorder %s1701_s20, 0  ;;  %p64_p3 = scmp.ne.s32.totalorder %s1685_s17, %s1681_s16 }
  0x17   : > { %s3238_s23 = smov (%p44_p0, %s42_s23), 0  ;;  %p65_p5 = scmp.eq.s32.totalorder %s1332_s21, 0 }
  0x18   : > { %3098 = sst [smem:[#allocation22_spill]] %s3238_s23  ;;  %p1780_p4 = por %p59_p2, %p58_p1 }
  0x19   : > { %s46_s26 = ssub.s32 %s1697_s0, %s3238_s23  ;;  %p114_p6 = scmp.eq.s32.totalorder %s1332_s21, 1 }
  0x1a   : > { %p49_p7 = scmp.eq.s32.totalorder %s46_s26, 0  ;;  %p1786_p8 = por %p65_p5, %p64_p3 }
  0x1b   : > { %p1790_p9 = por %p114_p6, %p58_p1  ;;  %p120_p10 = scmp.eq.s32.totalorder %s1333_s22, 1 }
  0x1c   : > { %s1795_s29 = scalar_select %p49_p7, %s1689_s18, %s51_s24  }
  0x1d   : > { %s3101_s28 = scalar_select %p1790_p9, 1, 0 }
  0x1e   : > { %3103 = sst [smem:[#allocation24_spill]] %s1795_s29  ;;  %p1797_p11 = por %p120_p10, %p64_p3 }
  0x1f   : > { %3102 = sst [smem:[#allocation23_spill]] %s3101_s28  ;;  %p1335_p12 = scmp.ge.s32.totalorder %s1701_s20, 2 }
  0x20   : > { %s3104_s30 = scalar_select %p1797_p11, 1, 0 }
  0x21   : > { %p1470_p13 = scmp.lt.s32.totalorder %s1701_s20, 2  ;;  %s1804_s4 = sand.u32 1, %s1689_s18  }
  0x22   : > { %3105 = sst [smem:[#allocation25_spill]] %s3104_s30  ;;  %s1336_s5 = sshll.u32 %s1804_s4, 6 }
  0x23   : > { %s1450_s6 = sshll.u32 %s1697_s0, 6  ;;  %s3106_s1 = sld [smem:[#allocation53_spill]] }
  0x24   : > { %s144_s10 = scalar_lea.vmem [#allocation6], %s1336_s5  ;;  %p1813_p0 = pnand %p1470_p13, %p1780_p4 }
  0x25   : > { %s155_s11 = sshll.u32 %s144_s10, 4  ;;  %p1342_p1 = scmp.ge.s32.totalorder %s1701_s20, 1  ;;  %s156_s11 = int_to_ptr.vmem [resolvable:$true] %s155_s11 }
  0x26   : > { %s141_s14 = scalar_lea.sflag [#allocation7], %s1804_s4  ;;  %s1704_s15 = smov 128  }
  0x27   : > { %s1705_s21 = smov 8   ;;  %p185_p2 = scmp.lt.s32.totalorder %s1701_s20, 3 }
  0x28   : > { %s1339_s22 = sshll.u32 %s1804_s4, 4  ;;  %s1451_s24 = sshll.u32 %s1697_s0, 4 }
  0x29   : > { %s152_s9 = scalar_lea.hbm %s3106_s1, %s1450_s6  ;;  %p186_p3 = pnand %p1342_p1, %p185_p2 }
  0x2a   : > { %s153_s12 = sshll.u32 %s152_s9, 4  ;;  %s3108_s2 = sld [smem:[#allocation54_spill]]  ;;  %s154_s12 = int_to_ptr.hbm [resolvable:$true] %s153_s12 }
  0x2b   : > { %1462 = dma.hbm_to_vmem [thread:$0]  (!%p1813_p0), %s154_s12, 1024, %s156_s11, %s141_s14, %s1704_s15, %s1704_s15, %s1705_s21  }
  0x2c   : > { %s169_s6 = scalar_lea.vmem [#allocation9], %s1339_s22  ;;  %s166_s9 = scalar_lea.sflag [#allocation10], %s1804_s4 }
  0x2d   : > { %s177_s7 = sshll.u32 %s169_s6, 4  ;;  %s178_s7 = int_to_ptr.vmem [resolvable:$true] %s177_s7 }
  0x2e   : > { %189 = sbr.rel (%p186_p3) target bundleno = 376 (0x178), region = 28 }
  0x30   : > { %s174_s25 = scalar_lea.hbm %s3108_s2, %s1451_s24 }
  0x31   : > { %s175_s8 = sshll.u32 %s174_s25, 4  ;;  %s176_s8 = int_to_ptr.hbm [resolvable:$true] %s175_s8 }
  0x32   : > { %1465 = dma.hbm_to_vmem [thread:$0]  (!%p1813_p0), %s176_s8, 256, %s178_s7, %s166_s9, %s1704_s15, %s1704_s15, %s1705_s21  }
  0x33   : > { %s1831_s10 = sand.u32 1, %s1685_s17  }
  0x34   : > { %3109 = sst [smem:[#allocation26_spill]] %s1831_s10  ;;  %s1343_s11 = sshll.u32 %s1831_s10, 6 }
  0x35   : > { %s192_s12 = scalar_lea.sflag [#allocation7], %s1831_s10  ;;  %s195_s14 = scalar_lea.vmem [#allocation6], %s1343_s11 }
  0x36   : > { %1668 = dma.done.wait (%p1786_p8), %s192_s12, 1024  }
  0x37   : > { %1670 = vsyncadd (%p1786_p8), %s192_s12, 4294966272  ;;  %s3027_s4 = sshll.u32 %s1831_s10, 4  ;;  %s202_s13 = scalar_lea.sflag [#allocation10], %s1831_s10 }
  0x38   : > { %s1843_s15 = scalar_lea.vmem [#allocation9], %s3027_s4 }
  0x39   : > { %3110 = sst [smem:[#allocation27_spill]] %s1843_s15 }
  0x3a   : > { %1672 = dma.done.wait (%p1786_p8), %s202_s13, 256  }
  0x3b   : > { %1674 = vsyncadd (%p1786_p8), %s202_s13, 4294967040  ;;  %v1706_v0 = vmov 0.0   ;;  %vm251_vm0 = vcmask 130048   ;;  %v241_v1 = vld [vmem:[%s195_s14] sm:$0xff]  ;;  %v243_v2 = vld [vmem:[%s195_s14 + $0x10] sm:$0xff]  ;;  %v293_v32 = vlaneseq  ;;  %v1707_v38 = vmov -inf  }
  0x3c   : > { %237 = vst [vmem:[#allocation2] sm:$0xff] %v1706_v0  ;;  %v245_v3 = vld [vmem:[%s195_s14 + $0x20] sm:$0xff]  ;;  %v247_v4 = vld [vmem:[%s195_s14 + $0x30] sm:$0xff]  ;;  %v252_v5 = vsel %vm251_vm0, %v241_v1, 0.0  ;;  %v253_v6 = vsel %vm251_vm0, %v243_v2, 0.0  ;;  %v242_v8 = vld [vmem:[%s195_s14 + $0x8] sm:$0xff] }
  0x3d   : > { %238 = vst [vmem:[#allocation2 + $0x8] sm:$0xff] %v1706_v0  ;;  %v255_v7 = vsel %vm251_vm0, %v245_v3, 0.0  ;;  %v244_v9 = vld [vmem:[%s195_s14 + $0x18] sm:$0xff]  ;;  %v254_v10 = vadd.f32 %v253_v6, %v252_v5  ;;  %v246_v11 = vld [vmem:[%s195_s14 + $0x28] sm:$0xff]  ;;  %v259_v13 = vsel %vm251_vm0, %v242_v8, 0.0  ;;  %v257_v15 = vsel %vm251_vm0, %v247_v4, 0.0 }
  0x3e   : > { %v248_v12 = vld [vmem:[%s195_s14 + $0x38] sm:$0xff]  ;;  %v260_v14 = vsel %vm251_vm0, %v244_v9, 0.0  ;;  %v262_v17 = vsel %vm251_vm0, %v246_v11, 0.0  ;;  %v279_v21 = vsel %vm251_vm0, %v242_v8, -inf  ;;  %v280_v22 = vsel %vm251_vm0, %v244_v9, -inf  ;;  %240 = vst [vmem:[#allocation3 + $0x8] sm:$0xff] %v1707_v38 }
  0x3f   : > { %v261_v16 = vadd.f32 %v260_v14, %v259_v13  ;;  %v256_v18 = vadd.f32 %v255_v7, %v254_v10  ;;  %v264_v19 = vsel %vm251_vm0, %v248_v12, 0.0  ;;  %v281_v23 = vsel %vm251_vm0, %v246_v11, -inf  ;;  %239 = vst [vmem:[#allocation3] sm:$0xff] %v1707_v38  ;;  %s1708_s27 = smov 2   ;;  %s1709_s21 = smov 3  }
  0x40   : > { %v282_v25 = vmax.f32 %v279_v21, %v281_v23  ;;  %v283_v26 = vsel %vm251_vm0, %v248_v12, -inf  ;;  %v272_v27 = vsel %vm251_vm0, %v241_v1, -inf  ;;  %v273_v30 = vsel %vm251_vm0, %v243_v2, -inf  ;;  %s1710_s22 = smov 1   ;;  %s1711_s24 = smov 127  }
  0x41   : > { %v263_v20 = vadd.f32 %v262_v17, %v261_v16  ;;  %v258_v24 = vadd.f32 %v257_v15, %v256_v18  ;;  %v284_v29 = vmax.f32 %v280_v22, %v283_v26  ;;  %v274_v31 = vsel %vm251_vm0, %v245_v3, -inf  ;;  %s1712_s26 = smov 126   ;;  %s1713_s5 = smov 125  }
  0x42   : > { %v275_v33 = vmax.f32 %v272_v27, %v274_v31  ;;  %v276_v34 = vsel %vm251_vm0, %v247_v4, -inf  ;;  %v1868_v39 = vand.u32 127, %v293_v32  ;;  %s1901_s25 = sld [smem:[#allocation5 + $0x2]]  ;;  %v1963_v56 = vshrl.u32 %v293_v32, 7 }
  0x43   : > { %v265_v28 = vadd.f32 %v264_v19, %v263_v20  ;;  %v285_v35 = vmax.f32 %v282_v25, %v284_v29  ;;  %v277_v36 = vmax.f32 %v273_v30, %v276_v34  ;;  %268 = vst.msk [vmem:[#allocation2] sm:$0xff] %vm251_vm0, %v258_v24  ;;  %s1903_s6 = sld [smem:[#allocation5 + $0x9]]  ;;  %v3123_v62 = vmov 0 }
  0x44   : > { %vm300_vm1 = vcmp.lt.s32.totalorder %v1868_v39, 16  ;;  %s1905_s7 = sld [smem:[#allocation5 + $0x10]]  ;;  %v321_v54 = vadd.s32 4294967295, %v1868_v39  ;;  %3121 = vst [vmem:[#allocation38_spill] sm:$0xff] %v1963_v56  ;;  %v1981_v1 = vadd.s32 4294967294, %v1868_v39  ;;  %v1995_v9 = vadd.s32 4294967293, %v1868_v39 }
  0x45   : > { %269 = vst.msk [vmem:[#allocation2 + $0x8] sm:$0xff] %vm251_vm0, %v265_v28  ;;  %v278_v37 = vmax.f32 %v275_v33, %v277_v36  ;;  %s1907_s8 = sld [smem:[#allocation5 + $0x17]]  ;;  %v2060_v34 = vadd.s32 2, %v1868_v39 }
  0x46   : > { %289 = vst.msk [vmem:[#allocation3 + $0x8] sm:$0xff] %vm251_vm0, %v285_v35  ;;  %s1909_s9 = sld [smem:[#allocation5 + $0x1e]]  ;;  %vm322_vm2 = vcmp.ge.s32.totalorder %v321_v54, 0  ;;  %vm323_vm3 = vcmp.lt.s32.totalorder %v321_v54, 16  ;;  %vm318_vm5 = vcmp.ge.s32.totalorder %v1981_v1, 0  ;;  %vm319_vm6 = vcmp.lt.s32.totalorder %v1981_v1, 16 }
  0x47   : > { %288 = vst.msk [vmem:[#allocation3] sm:$0xff] %vm251_vm0, %v278_v37  ;;  %s1911_s11 = sld [smem:[#allocation5 + $0x25]]  ;;  %vm1974_vm4 = vmand %vm322_vm2, %vm323_vm3  ;;  %vm314_vm7 = vcmp.ge.s32.totalorder %v1995_v9, 0  ;;  %vm315_vm8 = vcmp.lt.s32.totalorder %v1995_v9, 16  ;;  %vm333_vm9 = vcmp.lt.s32.totalorder %v2060_v34, 16  ;;  %v3136_v1 = vmov 0 }
  0x48   : > { %s1913_s12 = sld [smem:[#allocation5 + $0x2c]]  ;;  %v442_v57 = vstv %s1901_s25  ;;  %v3124_v62 = vsel %vm1974_vm4, 4294967295, %v3123_v62  ;;  %3131 = vst [vmem:[#allocation44_spill] sm:$0xff] %v2060_v34  ;;  %vm2155_vm10 = vmand %vm318_vm5, %vm319_vm6 }
  0x49   : > { %s1915_s14 = sld [smem:[#allocation5 + $0x1]]  ;;  %v493_v58 = vstv %s1903_s6  ;;  %3125 = vst [vmem:[#allocation40_spill] sm:$0xff] %v3124_v62  ;;  %vm2175_vm11 = vmand %vm314_vm7, %vm315_vm8 }
  0x4a   : > { %v303_v40 = vld [vmem:[#allocation2] sm:$0xff]  ;;  %s1917_s13 = sld [smem:[#allocation5 + $0x8]]  ;;  %v544_v59 = vstv %s1905_s7  ;;  %v3137_v1 = vsel %vm2175_vm11, 4294967295, %v3136_v1 }
  0x4b   : > { %v305_v41 = vmul.f32 0.25, %v303_v40  ;;  %s1931_s4 = sld [smem:[#allocation5 + $0x7]]  ;;  %v595_v60 = vstv %s1907_s8  ;;  %3138 = vst [vmem:[#allocation46_spill] sm:$0xff] %v3137_v1 }
  0x4c   : > { %v304_v42 = vld [vmem:[#allocation2 + $0x8] sm:$0xff]  ;;  %s1933_s1 = sld [smem:[#allocation5 + $0xe]]  ;;  %v641_v61 = vstv %s1909_s9 }
  0x4d   : > { %v306_v43 = vmul.f32 0.25, %v304_v42  ;;  %v307_v44 = vsel %vm300_vm1, %v305_v41, 0.0  ;;  %v310_v45 = vld [vmem:[#allocation3 + $0x8] sm:$0xff]  ;;  %s1935_s2 = sld [smem:[#allocation5 + $0x15]]  ;;  %v692_v63 = vstv %s1911_s11 }
  0x4e   : > { %397 = vrot.lane.b32.xlu1 %v307_v44, %s1708_s27  ;;  %v1878_v46 = vsel %vm300_vm1, %v307_v44, 0.0  ;;  %391 = vrot.lane.b32.xlu0 %v307_v44, %s1709_s21  ;;  %v312_v48 = vsel %vm300_vm1, %v310_v45, 0.0  ;;  %v309_v51 = vld [vmem:[#allocation3] sm:$0xff]  ;;  %s1937_s23 = sld [smem:[#allocation5 + $0x1c]]  ;;  %v743_v0 = vstv %s1913_s12 }
  0x4f   : > { %v308_v47 = vsel %vm300_vm1, %v306_v43, 0.0  ;;  %403 = vrot.lane.b32.xlu2 %v307_v44, %s1710_s22  ;;  %v1890_v50 = vsel %vm300_vm1, %v312_v48, 0.0  ;;  %v311_v52 = vsel %vm300_vm1, %v309_v51, 0.0  ;;  %3113 = sst [smem:[#allocation30_spill]] %s1915_s14  ;;  %v3069_v2 = vstv %s1915_s14 }
  0x50   : > { %v1886_v49 = vsel %vm300_vm1, %v308_v47, 0.0  ;;  %3111 = vst [vmem:[#allocation28_spill] sm:$0xff] %v1890_v50  ;;  %v1896_v53 = vsel %vm300_vm1, %v311_v52, 0.0  ;;  %s1939_s0 = sld [smem:[#allocation5 + $0x23]]  ;;  %v3071_v3 = vstv %s1917_s13 }
  0x51   : > { %3112 = vst [vmem:[#allocation29_spill] sm:$0xff] %v1896_v53  ;;  %3116 = sst [smem:[#allocation33_spill]] %s1931_s4  ;;  %v3081_v12 = vstv %s1931_s4 }
  0x52   : > { %s1941_s29 = sld [smem:[#allocation5 + $0x2a]]  ;;  %v3150_v53 = vstv %s1933_s1 }
  0x53   : > { %s1943_s18 = sld [smem:[#allocation5 + $0x3]]  ;;  %v3151_v50 = vstv %s1935_s2 }
  0x54   : > { %s1945_s17 = sld [smem:[#allocation5 + $0xa]] }
  0x55   : > { %s1947_s20 = sld [smem:[#allocation5 + $0x4]] }
  0x56   : > { %399 = vrot.lane.b32.xlu1 %v308_v47, %s1708_s27  ;;  %393 = vrot.lane.b32.xlu0 %v308_v47, %s1709_s21  ;;  %3117 = sst [smem:[#allocation34_spill]] %s1939_s0 }
  0x57   : > { %405 = vrot.lane.b32.xlu2 %v308_v47, %s1710_s22  ;;  %s1949_s30 = sld [smem:[#allocation5 + $0x5]] }
  0x58   : > { %3118 = sst [smem:[#allocation35_spill]] %s1941_s29 }
  0x59   : > { %s1952_s16 = sld [smem:[#allocation5 + $0xc]]  ;;  %v448_v18 = vstv %s1943_s18 }
  0x5a   : > { %s1954_s28 = sld [smem:[#allocation5 + $0x11]]  ;;  %v499_v20 = vstv %s1945_s17  ;;  %v2065_v35 = vmul.f32 %v448_v18, %v1878_v46 }
  0x5b   : > { %3119 = sst [smem:[#allocation36_spill]] %s1947_s20  ;;  %v2072_v38 = vmul.f32 %v499_v20, %v1878_v46 }
  0x5c   : > { %s1956_s3 = sld [smem:[#allocation5 + $0x18]] }
  0x5d   : > { %s1958_s10 = sld [smem:[#allocation5 + $0x1f]]  ;;  %v3057_v36 = vstv %s1949_s30 }
  0x5e   : > { %413 = vrot.lane.b32.xlu1 %v308_v47, %s1711_s24  ;;  %411 = vrot.lane.b32.xlu0 %v307_v44, %s1711_s24  ;;  %s1960_s19 = sld [smem:[#allocation5 + $0x26]] }
  0x5f   : > { %417 = vrot.lane.b32.xlu2 %v307_v44, %s1712_s26  ;;  %3120 = sst [smem:[#allocation37_spill]] %s1952_s16 }
  0x60   : > { %s1966_s15 = sld [smem:[#allocation5 + $0x2d]]  ;;  %v550_v21 = vstv %s1954_s28 }
  0x61   : > { %s1972_s20 = sld [smem:[#allocation5 + $0x13]]  ;;  %v2075_v40 = vmul.f32 %v550_v21, %v1878_v46 }
  0x62   : > { %s1984_s16 = sld [smem:[#allocation5 + $0x1a]]  ;;  %v601_v22 = vstv %s1956_s3 }
  0x63   : > { %s1998_s14 = sld [smem:[#allocation5 + $0x28]]  ;;  %v647_v23 = vstv %s1958_s10 }
  0x64   : > { %s2015_s4 = sld [smem:[#allocation5 + $0x12]]  ;;  %v698_v26 = vstv %s1960_s19  ;;  %v2141_v17 = vmul.f32 %v647_v23, %v1886_v49 }
  0x65   : > { %s2029_s18 = sld [smem:[#allocation5 + $0x19]] }
  0x66   : > { %423 = vrot.lane.b32.xlu1 %v307_v44, %s1713_s5  ;;  %419 = vrot.lane.b32.xlu0 %v308_v47, %s1712_s26  ;;  %s3129_s17 = sld [smem:[#allocation37_spill]]  ;;  %v749_v27 = vstv %s1966_s15 }
  0x67   : > { %425 = vrot.lane.b32.xlu2 %v308_v47, %s1713_s5  ;;  %3122 = sst [smem:[#allocation39_spill]] %s1972_s20  ;;  %v2191_v16 = vmul.f32 %v749_v27, %v1878_v46 }
  0x68   : > { %3126 = sst [smem:[#allocation41_spill]] %s1984_s16  ;;  %v3062_v42 = vstv %s1984_s16 }
  0x69   : > { %s1990_s20 = sld [smem:[#allocation5 + $0x21]]  ;;  %v3064_v44 = vstv %s1998_s14 }
  0x6a   : > { %3127 = sst [smem:[#allocation42_spill]] %s1998_s14 }
  0x6b   : > { %s3130_s3 = sld [smem:[#allocation39_spill]] }
  0x6c   : > { %s2051_s19 = sld [smem:[#allocation5 + $0x20]]  ;;  %v3058_v37 = vstv %s3129_s17 }
  0x6d   : > { %s2062_s28 = sld [smem:[#allocation5 + $0x27]] }
  0x6e   : > { %783 = vrot.lane.b32.xlu1 %v312_v48, %s1709_s21  ;;  %781 = vrot.lane.b32.xlu0 %v311_v52, %s1709_s21  ;;  %s1921_s21 = sld [smem:[#allocation5 + $0x16]] }
  0x6f   : > { %787 = vrot.lane.b32.xlu2 %v311_v52, %s1708_s27  ;;  %s2069_s10 = sld [smem:[#allocation5 + $0x2e]]  ;;  %v3063_v43 = vstv %s1990_s20 }
  0x70   : > { %s3132_s15 = sld [smem:[#allocation36_spill]] }
  0x71   : > { %v3060_v41 = vstv %s3130_s3  ;;  %s2081_s29 = sld [smem:[#allocation5 + $0x6]] }
  0x72   : > { %s2099_s0 = sld [smem:[#allocation5 + $0xd]] }
  0x73   : > { %s2114_s25 = sld [smem:[#allocation5 + $0x14]] }
  0x74   : > { %v3075_v5 = vstv %s1921_s21  ;;  %s2124_s6 = sld [smem:[#allocation5 + $0x1b]] }
  0x75   : > { %s2169_s7 = sld [smem:[#allocation5 + $0x22]] }
  0x76   : > { %793 = vrot.lane.b32.xlu1 %v311_v52, %s1710_s22  ;;  %789 = vrot.lane.b32.xlu0 %v312_v48, %s1708_s27  ;;  %s1919_s27 = sld [smem:[#allocation5 + $0xf]] }
  0x77   : > { %795 = vrot.lane.b32.xlu2 %v312_v48, %s1710_s22  ;;  %s1923_s22 = sld [smem:[#allocation5 + $0x1d]] }
  0x78   : > { %s2193_s8 = sld [smem:[#allocation5 + $0x29]] }
  0x79   : > { %s3139_s9 = sld [smem:[#allocation30_spill]] }
  0x7a   : > { %s2211_s11 = sld [smem:[#allocation5 + $0x30]] }
  0x7b   : > { %s3147_s3 = sld [smem:[#allocation33_spill]] }
  0x7c   : > { %v3072_v4 = vstv %s1919_s27  ;;  %s3148_s14 = sld [smem:[#allocation34_spill]] }
  0x7d   : > { %v3078_v6 = vstv %s1923_s22 }
  0x7e   : > { %803 = vrot.lane.b32.xlu1 %v312_v48, %s1711_s24  ;;  %801 = vrot.lane.b32.xlu0 %v311_v52, %s1711_s24  ;;  %s1925_s24 = sld [smem:[#allocation5 + $0x24]] }
  0x7f   : > { %807 = vrot.lane.b32.xlu2 %v311_v52, %s1712_s26 }
  0x84   : > { %3114 = sst [smem:[#allocation31_spill]] %s1925_s24  ;;  %v3080_v7 = vstv %s1925_s24 }
  0x85   : > { %s2005_s24 = sld [smem:[#allocation5 + $0xb]] }
  0x86   : > { %813 = vrot.lane.b32.xlu1 %v311_v52, %s1713_s5  ;;  %809 = vrot.lane.b32.xlu0 %v312_v48, %s1712_s26  ;;  %s1927_s26 = sld [smem:[#allocation5 + $0x2b]] }
  0x87   : > { %815 = vrot.lane.b32.xlu2 %v312_v48, %s1713_s5  ;;  %s1929_s5 = sld [smem:[#allocation5]] }
  0x88   : > { %s3144_s12 = sld [smem:[#allocation31_spill]] }
  0x8c   : > { %v3083_v8 = vstv %s1927_s26 }
  0x8d   : > { %3115 = sst [smem:[#allocation32_spill]] %s1929_s5  ;;  %v3082_v10 = vstv %s1929_s5 }
  0x8e   : > { %s2010_s5 = sld [smem:[#allocation5 + $0x2f]] }
  0x8f   : > { %s3145_s16 = sld [smem:[#allocation32_spill]] }
  0x94   : > { %3128 = sst [smem:[#allocation43_spill]] %s2010_s5 }
  0xa9   : > { %v404_v55 = vpop.permute.xlu2 %403 }
  0xaa   : > { %v407_v11 = vsel %vm1974_vm4, %v404_v55, 0.0 }
  0xab   : > { %v2021_v24 = vmul.f32 %v442_v57, %v407_v11  ;;  %v2025_v25 = vmul.f32 %v493_v58, %v407_v11  ;;  %v2035_v28 = vmul.f32 %v544_v59, %v407_v11  ;;  %v2039_v29 = vmul.f32 %v595_v60, %v407_v11 }
  0xac   : > { %v2043_v30 = vmul.f32 %v641_v61, %v407_v11  ;;  %v2047_v31 = vmul.f32 %v692_v63, %v407_v11  ;;  %v2055_v32 = vmul.f32 %v743_v0, %v407_v11  ;;  %v2131_v11 = vmul.f32 %v550_v21, %v1886_v49 }
  0xb1   : > { %v406_v19 = vpop.permute.xlu2 %405 }
  0xb2   : > { %v408_v33 = vsel %vm1974_vm4, %v406_v19, 0.0  ;;  %v2149_v19 = vmul.f32 %v749_v27, %v1886_v49 }
  0xb3   : > { %v2085_v45 = vmul.f32 %v442_v57, %v408_v33  ;;  %v2089_v47 = vmul.f32 %v493_v58, %v408_v33  ;;  %v2093_v48 = vmul.f32 %v544_v59, %v408_v33  ;;  %v2097_v51 = vmul.f32 %v595_v60, %v408_v33 }
  0xb4   : > { %v2103_v52 = vmul.f32 %v641_v61, %v408_v33  ;;  %v2107_v54 = vmul.f32 %v692_v63, %v408_v33  ;;  %v2111_v55 = vmul.f32 %v743_v0, %v408_v33  ;;  %v3067_v57 = vstv %s2010_s5  ;;  %s3149_s5 = sld [smem:[#allocation35_spill]] }
  0xb5   : > { %v2118_v58 = vadd.s32 1, %v1868_v39  ;;  %v2121_v59 = vmul.f32 %v448_v18, %v1886_v49  ;;  %v2127_v63 = vmul.f32 %v499_v20, %v1886_v49  ;;  %v2137_v18 = vmul.f32 %v601_v22, %v1886_v49 }
  0xb6   : > { %v2145_v20 = vmul.f32 %v698_v26, %v1886_v49  ;;  %v2161_v60 = vmul.f32 %v601_v22, %v1878_v46  ;;  %v2164_v0 = vmul.f32 %v647_v23, %v1878_v46  ;;  %v2167_v49 = vadd.s32 3, %v1868_v39 }
  0xb7   : > { %v2188_v39 = vmul.f32 %v698_v26, %v1878_v46  ;;  %vm329_vm13 = vcmp.lt.s32.totalorder %v2118_v58, 16 }
  0xb8   : > { %vm337_vm12 = vcmp.lt.s32.totalorder %v2167_v49, 16 }
  0xb9   : > { %v418_v61 = vpop.permute.xlu2 %417 }
  0xba   : > { %v421_v33 = vsel %vm333_vm9, %v418_v61, 0.0  ;;  %v3133_v61 = vmov 0 }
  0xbb   : > { %v3134_v61 = vsel %vm2155_vm10, 4294967295, %v3133_v61  ;;  %v2181_v22 = vmul.f32 %v3057_v36, %v421_v33  ;;  %v2185_v23 = vmul.f32 %v3058_v37, %v421_v33  ;;  %v2197_v9 = vmul.f32 %v3060_v41, %v421_v33 }
  0xbc   : > { %3135 = vst [vmem:[#allocation45_spill] sm:$0xff] %v3134_v61  ;;  %v2201_v36 = vmul.f32 %v3062_v42, %v421_v33  ;;  %v2205_v37 = vmul.f32 %v3063_v43, %v421_v33  ;;  %v2209_v26 = vmul.f32 %v3064_v44, %v421_v33  ;;  %v2215_v41 = vmul.f32 %v3067_v57, %v421_v33 }
  0xbd   : > { %3140 = vst [vmem:[#allocation47_spill] sm:$0xff] %v2197_v9  ;;  %v3167_v61 = vstv %s1935_s2  ;;  %s3204_s2 = sld [smem:[#allocation39_spill]] }
  0xbe   : > { %3141 = vst [vmem:[#allocation48_spill] sm:$0xff] %v2201_v36 }
  0xbf   : > { %3142 = vst [vmem:[#allocation49_spill] sm:$0xff] %v2205_v37 }
  0xc0   : > { %3143 = vst [vmem:[#allocation50_spill] sm:$0xff] %v2209_v26  ;;  %v398_v46 = vpop.permute.xlu1 %397  ;;  %v392_v27 = vpop.permute.xlu0 %391 }
  0xc1   : > { %3146 = vst [vmem:[#allocation51_spill] sm:$0xff] %v2215_v41  ;;  %v401_v44 = vsel %vm2155_vm10, %v398_v46, 0.0  ;;  %v395_v15 = vsel %vm2175_vm11, %v392_v27, 0.0 }
  0xc2   : > { %v437_v33 = vmul.f32 %v3069_v2, %v401_v44  ;;  %v488_v57 = vmul.f32 %v3071_v3, %v401_v44  ;;  %v539_v43 = vmul.f32 %v3072_v4, %v401_v44  ;;  %v590_v21 = vmul.f32 %v3075_v5, %v401_v44  ;;  %v426_v5 = vpop.permute.xlu2 %425 }
  0xc3   : > { %v636_v42 = vmul.f32 %v3078_v6, %v401_v44  ;;  %v687_v46 = vmul.f32 %v3080_v7, %v401_v44  ;;  %v738_v27 = vmul.f32 %v3083_v8, %v401_v44  ;;  %v431_v13 = vmul.f32 %v3082_v10, %v395_v15 }
  0xc4   : > { %v482_v14 = vmul.f32 %v3081_v12, %v395_v15  ;;  %v533_v2 = vmul.f32 %v3150_v53, %v395_v15  ;;  %v584_v3 = vmul.f32 %v3151_v50, %v395_v15  ;;  %v3152_v4 = vstv %s1937_s23 }
  0xc5   : > { %v630_v62 = vmul.f32 %v3152_v4, %v395_v15  ;;  %v439_v34 = vadd.f32 %v437_v33, %v431_v13  ;;  %v3153_v6 = vstv %s3148_s14  ;;  %v3154_v7 = vstv %s3149_s5 }
  0xc6   : > { %v681_v56 = vmul.f32 %v3153_v6, %v395_v15  ;;  %v732_v41 = vmul.f32 %v3154_v7, %v395_v15  ;;  %v2256_v44 = vsel %vm337_vm12, %v426_v5, 0.0  ;;  %v490_v12 = vadd.f32 %v488_v57, %v482_v14 }
  0xc7   : > { %v541_v10 = vadd.f32 %v539_v43, %v533_v2  ;;  %v592_v8 = vadd.f32 %v590_v21, %v584_v3  ;;  %v445_v53 = vadd.f32 %v2021_v24, %v439_v34  ;;  %v638_v4 = vadd.f32 %v636_v42, %v630_v62 }
  0xc8   : > { %v496_v5 = vadd.f32 %v2025_v25, %v490_v12  ;;  %v689_v13 = vadd.f32 %v687_v46, %v681_v56  ;;  %v740_v2 = vadd.f32 %v738_v27, %v732_v41  ;;  %v400_v3 = vpop.permute.xlu1 %399  ;;  %v394_v14 = vpop.permute.xlu0 %393  ;;  %v3155_v15 = vstv %s2081_s29 }
  0xc9   : > { %v2267_v24 = vmul.f32 %v3155_v15, %v2256_v44  ;;  %v2270_v62 = vadd.f32 %v2035_v28, %v541_v10  ;;  %v2273_v34 = vadd.f32 %v2039_v29, %v592_v8  ;;  %v402_v56 = vsel %vm2155_vm10, %v400_v3, 0.0 }
  0xca   : > { %v396_v12 = vsel %vm2175_vm11, %v394_v14, 0.0  ;;  %v3157_v25 = vstv %s3139_s9  ;;  %v3158_v42 = vstv %s1917_s13  ;;  %v3159_v57 = vstv %s1919_s27  ;;  %s2482_s13 = sld [smem:[#allocation5 + $0x4e]] }
  0xcb   : > { %3156 = vst [vmem:[#allocation52_spill] sm:$0xff] %v2267_v24  ;;  %v438_v41 = vmul.f32 %v3157_v25, %v402_v56  ;;  %v489_v43 = vmul.f32 %v3158_v42, %v402_v56  ;;  %v540_v21 = vmul.f32 %v3159_v57, %v402_v56  ;;  %v3160_v33 = vstv %s1921_s21  ;;  %s2492_s27 = sld [smem:[#allocation5 + $0x55]] }
  0xcc   : > { %v591_v10 = vmul.f32 %v3160_v33, %v402_v56  ;;  %v3161_v28 = vstv %s1923_s22  ;;  %v3162_v8 = vstv %s3144_s12  ;;  %v3163_v27 = vstv %s1927_s26  ;;  %s2510_s21 = sld [smem:[#allocation5 + $0x38]] }
  0xcd   : > { %v637_v46 = vmul.f32 %v3161_v28, %v402_v56  ;;  %v688_v29 = vmul.f32 %v3162_v8, %v402_v56  ;;  %v739_v15 = vmul.f32 %v3163_v27, %v402_v56  ;;  %v3164_v3 = vstv %s3145_s16  ;;  %s2458_s16 = sld [smem:[#allocation5 + $0x39]] }
  0xce   : > { %v432_v7 = vmul.f32 %v3164_v3, %v396_v12  ;;  %v3165_v6 = vstv %s3147_s3  ;;  %v3166_v14 = vstv %s1933_s1  ;;  %v585_v25 = vmul.f32 %v3167_v61, %v396_v12  ;;  %s2435_s1 = sld [smem:[#allocation5 + $0x32]] }
  0xcf   : > { %v483_v50 = vmul.f32 %v3165_v6, %v396_v12  ;;  %v534_v1 = vmul.f32 %v3166_v14, %v396_v12  ;;  %v3168_v24 = vstv %s1937_s23  ;;  %v644_v57 = vadd.f32 %v2043_v30, %v638_v4  ;;  %s3206_s23 = sld [smem:[#allocation42_spill]] }
  0xd0   : > { %v631_v42 = vmul.f32 %v3168_v24, %v396_v12  ;;  %v440_v26 = vadd.f32 %v438_v41, %v432_v7  ;;  %v3169_v33 = vstv %s3148_s14  ;;  %v3170_v28 = vstv %s3149_s5  ;;  %s2473_s14 = sld [smem:[#allocation5 + $0x47]] }
  0xd1   : > { %v682_v36 = vmul.f32 %v3169_v33, %v396_v12  ;;  %v733_v37 = vmul.f32 %v3170_v28, %v396_v12  ;;  %v491_v8 = vadd.f32 %v489_v43, %v483_v50  ;;  %v542_v9 = vadd.f32 %v540_v21, %v534_v1  ;;  %v414_v50 = vpop.permute.xlu1 %413  ;;  %s2516_s22 = sld [smem:[#allocation5 + $0x3f]] }
  0xd2   : > { %v593_v56 = vadd.f32 %v591_v10, %v585_v25  ;;  %v639_v27 = vadd.f32 %v637_v46, %v631_v42  ;;  %v695_v6 = vadd.f32 %v2047_v31, %v689_v13  ;;  %v446_v3 = vadd.f32 %v2085_v45, %v440_v26  ;;  %s2522_s26 = sld [smem:[#allocation5 + $0x4d]] }
  0xd3   : > { %v690_v61 = vadd.f32 %v688_v29, %v682_v36  ;;  %v741_v14 = vadd.f32 %v739_v15, %v733_v37  ;;  %v497_v30 = vadd.f32 %v2089_v47, %v491_v8  ;;  %v548_v4 = vadd.f32 %v2093_v48, %v542_v9  ;;  %s2540_s5 = sld [smem:[#allocation5 + $0x54]] }
  0xd4   : > { %v599_v7 = vadd.f32 %v2097_v51, %v593_v56  ;;  %v645_v1 = vadd.f32 %v2103_v52, %v639_v27  ;;  %v746_v24 = vadd.f32 %v2055_v32, %v740_v2  ;;  %v416_v36 = vsel %vm329_vm13, %v414_v50, 0.0  ;;  %s2593_s3 = sld [smem:[#allocation5 + $0x3a]] }
  0xd5   : > { %v696_v31 = vadd.f32 %v2107_v54, %v690_v61  ;;  %v451_v37 = vadd.f32 %v2065_v35, %v445_v53  ;;  %v747_v45 = vadd.f32 %v2111_v55, %v741_v14  ;;  %v3171_v47 = vstv %s3132_s15  ;;  %v412_v35 = vpop.permute.xlu0 %411  ;;  %s2627_s15 = sld [smem:[#allocation5 + $0x56]] }
  0xd6   : > { %v456_v48 = vmul.f32 %v3171_v47, %v416_v36  ;;  %v3172_v9 = vstv %s2005_s24  ;;  %v502_v52 = vadd.f32 %v2072_v38, %v496_v5  ;;  %v452_v32 = vadd.f32 %v2121_v59, %v446_v3  ;;  %s2519_s24 = sld [smem:[#allocation5 + $0x46]] }
  0xd7   : > { %v507_v51 = vmul.f32 %v3172_v9, %v416_v36  ;;  %v503_v26 = vadd.f32 %v2127_v63, %v497_v30  ;;  %v3173_v54 = vstv %s2015_s4  ;;  %v3174_v2 = vstv %s2029_s18  ;;  %s2466_s4 = sld [smem:[#allocation5 + $0x40]] }
  0xd8   : > { %v558_v13 = vmul.f32 %v3173_v54, %v416_v36  ;;  %v609_v12 = vmul.f32 %v3174_v2, %v416_v36  ;;  %v554_v55 = vadd.f32 %v2131_v11, %v548_v4  ;;  %v605_v53 = vadd.f32 %v2137_v18, %v599_v7  ;;  %s2558_s18 = sld [smem:[#allocation5 + $0x5b]] }
  0xd9   : > { %v651_v41 = vadd.f32 %v2141_v17, %v645_v1  ;;  %v3175_v38 = vstv %s2051_s19  ;;  %v2336_v59 = vadd.f32 %v456_v48, %v452_v32  ;;  %v2338_v63 = vadd.f32 %v507_v51, %v503_v26  ;;  %s2603_s19 = sld [smem:[#allocation5 + $0x41]] }
  0xda   : > { %v655_v5 = vmul.f32 %v3175_v38, %v416_v36  ;;  %v702_v43 = vadd.f32 %v2145_v20, %v696_v31  ;;  %v3176_v21 = vstv %s2062_s28  ;;  %v2343_v46 = vadd.f32 %v558_v13, %v554_v55  ;;  %s2608_s28 = sld [smem:[#allocation5 + $0x48]] }
  0xdb   : > { %v706_v10 = vmul.f32 %v3176_v21, %v416_v36  ;;  %v2345_v29 = vadd.f32 %v609_v12, %v605_v53  ;;  %v3177_v11 = vstv %s2069_s10  ;;  %v415_v17 = vsel %vm329_vm13, %v412_v35, 0.0  ;;  %s2618_s10 = sld [smem:[#allocation5 + $0x4f]] }
  0xdc   : > { %v757_v18 = vmul.f32 %v3177_v11, %v416_v36  ;;  %v753_v15 = vadd.f32 %v2149_v19, %v747_v45  ;;  %v3178_v25 = vmov %v3171_v47  ;;  %v3179_v33 = vmov %v3172_v9  ;;  %v424_v45 = vpop.permute.xlu1 %423  ;;  %s2664_s9 = sld [smem:[#allocation5 + $0x49]] }
  0xdd   : > { %v455_v42 = vmul.f32 %v3178_v25, %v415_v17  ;;  %v506_v28 = vmul.f32 %v3179_v33, %v415_v17  ;;  %v3180_v20 = vmov %v3173_v54  ;;  %v2358_v56 = vadd.f32 %v655_v5, %v651_v41  ;;  %s2674_s12 = sld [smem:[#allocation5 + $0x35]] }
  0xde   : > { %v557_v8 = vmul.f32 %v3180_v20, %v415_v17  ;;  %v2360_v27 = vadd.f32 %v706_v10, %v702_v43  ;;  %v553_v3 = vadd.f32 %v2075_v40, %v2270_v62  ;;  %v3181_v61 = vmov %v3174_v2 }
  0xdf   : > { %v608_v14 = vmul.f32 %v3181_v61, %v415_v17  ;;  %v2366_v30 = vadd.f32 %v757_v18, %v753_v15  ;;  %v604_v19 = vadd.f32 %v2161_v60, %v2273_v34  ;;  %v650_v4 = vadd.f32 %v2164_v0, %v644_v57 }
  0xe0   : > { %v3182_v7 = vmov %v3175_v38  ;;  %v457_v50 = vadd.f32 %v455_v42, %v451_v37  ;;  %v508_v31 = vadd.f32 %v506_v28, %v502_v52  ;;  %v701_v36 = vadd.f32 %v2188_v39, %v695_v6  ;;  %v3197_v28 = vld [vmem:[#allocation48_spill] sm:$0xff] }
  0xe1   : > { %v654_v1 = vmul.f32 %v3182_v7, %v415_v17  ;;  %v3183_v40 = vmov %v3176_v21  ;;  %v559_v47 = vadd.f32 %v557_v8, %v553_v3  ;;  %v610_v48 = vadd.f32 %v608_v14, %v604_v19  ;;  %v3193_v21 = vld [vmem:[#allocation47_spill] sm:$0xff]  ;;  %v3198_v8 = vld [vmem:[#allocation50_spill] sm:$0xff] }
  0xe2   : > { %v705_v62 = vmul.f32 %v3183_v40, %v415_v17  ;;  %v752_v60 = vadd.f32 %v2191_v16, %v746_v24  ;;  %v3184_v0 = vmov %v3177_v11  ;;  %v3185_v37 = vstv %s2099_s0  ;;  %v3201_v7 = vld [vmem:[#allocation51_spill] sm:$0xff]  ;;  %s3205_s0 = sld [smem:[#allocation41_spill]] }
  0xe3   : > { %v756_v34 = vmul.f32 %v3184_v0, %v415_v17  ;;  %v656_v57 = vadd.f32 %v654_v1, %v650_v4  ;;  %v2382_v51 = vmul.f32 %v3185_v37, %v2256_v44  ;;  %v3186_v39 = vstv %s2114_s25  ;;  %s2635_s25 = sld [smem:[#allocation5 + $0x5d]] }
  0xe4   : > { %v707_v9 = vadd.f32 %v705_v62, %v701_v36  ;;  %v2387_v6 = vmul.f32 %v3186_v39, %v2256_v44  ;;  %v3187_v32 = vstv %s2124_s6  ;;  %v3188_v16 = vstv %s2169_s7  ;;  %s2647_s6 = sld [smem:[#allocation5 + $0x34]] }
  0xe5   : > { %v758_v52 = vadd.f32 %v756_v34, %v752_v60  ;;  %v2392_v26 = vmul.f32 %v3187_v32, %v2256_v44  ;;  %v2397_v24 = vmul.f32 %v3188_v16, %v2256_v44  ;;  %v427_v54 = vsel %vm337_vm12, %v424_v45, 0.0  ;;  %v3203_v45 = vld [vmem:[#allocation38_spill] sm:$0xff]  ;;  %s2656_s7 = sld [smem:[#allocation5 + $0x3b]] }
  0xe6   : > { %v463_v13 = vadd.f32 %v2181_v22, %v457_v50  ;;  %v3189_v2 = vstv %s2081_s29  ;;  %v514_v35 = vadd.f32 %v2185_v23, %v508_v31  ;;  %v3190_v55 = vmov %v3185_v37  ;;  %v3195_v23 = vld [vmem:[#allocation49_spill] sm:$0xff]  ;;  %s3207_s29 = sld [smem:[#allocation43_spill]] }
  0xe7   : > { %v467_v12 = vmul.f32 %v3189_v2, %v427_v54  ;;  %v518_v53 = vmul.f32 %v3190_v55, %v427_v54  ;;  %v3191_v41 = vstv %s2193_s8  ;;  %v3192_v5 = vstv %s2211_s11  ;;  %s2660_s8 = sld [smem:[#allocation5 + $0x42]] }
  0xe8   : > { %v2410_v38 = vmul.f32 %v3191_v41, %v2256_v44  ;;  %v2415_v43 = vmul.f32 %v3192_v5, %v2256_v44  ;;  %v565_v10 = vadd.f32 %v3193_v21, %v559_v47  ;;  %v3194_v11 = vmov %v3186_v39  ;;  %s2672_s11 = sld [smem:[#allocation5 + $0x50]] }
  0xe9   : > { %v569_v22 = vmul.f32 %v3194_v11, %v427_v54  ;;  %v2420_v18 = vadd.f32 %v467_v12, %v463_v13  ;;  %v2422_v17 = vadd.f32 %v518_v53, %v514_v35  ;;  %v662_v15 = vadd.f32 %v3195_v23, %v656_v57 }
  0xea   : > { %v3196_v25 = vmov %v3188_v16  ;;  %v2430_v20 = vadd.f32 %v3197_v28, %v610_v48  ;;  %v713_v44 = vadd.f32 %v3198_v8, %v707_v9  ;;  %v3199_v3 = vmov %v3191_v41  ;;  %v420_v48 = vpop.permute.xlu0 %419 }
  0xeb   : > { %v666_v42 = vmul.f32 %v3196_v25, %v427_v54  ;;  %v2427_v33 = vadd.f32 %v569_v22, %v565_v10  ;;  %v717_v61 = vmul.f32 %v3199_v3, %v427_v54  ;;  %v3200_v14 = vmov %v3187_v32 }
  0xec   : > { %v2439_v19 = vmul.f32 %v3200_v14, %v427_v54  ;;  %v764_v1 = vadd.f32 %v3201_v7, %v758_v52  ;;  %v3202_v50 = vmov %v3192_v5  ;;  %v471_v36 = vrot.slane %v2420_v18, 5 }
  0xed   : > { %v2441_v4 = vadd.f32 %v666_v42, %v662_v15  ;;  %v768_v31 = vmul.f32 %v3202_v50, %v427_v54  ;;  %v522_v40 = vrot.slane %v2422_v17, 6  ;;  %v2448_v62 = vadd.f32 %v717_v61, %v713_v44 }
  0xee   : > { %v2451_v47 = vadd.s32 8, %v3203_v45  ;;  %v573_v60 = vrot.slane %v2427_v33, 7  ;;  %vm473_vm14 = vcmp.lt.s32.totalorder %v3203_v45, 3  ;;  %vm524_vm15 = vcmp.lt.s32.totalorder %v3203_v45, 2 }
  0xef   : > { %v670_v0 = vrot.slane %v2441_v4, 1  ;;  %v2455_v34 = vadd.f32 %v768_v31, %v764_v1  ;;  %v721_v57 = vrot.slane %v2448_v62, 2  ;;  %vm575_vm0 = vcmp.lt.s32.totalorder %v3203_v45, 1 }
  0xf0   : > { %v2462_v9 = vadd.s32 1, %v2451_v47  ;;  %vm672_vm1 = vcmp.lt.s32.totalorder %v3203_v45, 7  ;;  %vm723_vm2 = vcmp.lt.s32.totalorder %v3203_v45, 6  ;;  %v422_v52 = vsel %vm333_vm9, %v420_v48, 0.0 }
  0xf1   : > { %v772_v37 = vrot.slane %v2455_v34, 3  ;;  %vm774_vm3 = vcmp.lt.s32.totalorder %v3203_v45, 5  ;;  %v3209_v32 = vstv %s1949_s30  ;;  %v3210_v54 = vstv %s3129_s17  ;;  %s2498_s30 = sld [smem:[#allocation5 + $0x5c]] }
  0xf2   : > { %v462_v16 = vmul.f32 %v3209_v32, %v422_v52  ;;  %v513_v13 = vmul.f32 %v3210_v54, %v422_v52  ;;  %v3211_v2 = vstv %s3204_s2  ;;  %v3212_v35 = vstv %s3205_s0  ;;  %s2582_s17 = sld [smem:[#allocation5 + $0x33]]  ;;  %v782_v54 = vpop.permute.xlu0 %781 }
  0xf3   : > { %v564_v12 = vmul.f32 %v3211_v2, %v422_v52  ;;  %v615_v55 = vmul.f32 %v3212_v35, %v422_v52  ;;  %v3213_v53 = vstv %s1990_s20  ;;  %v3214_v5 = vstv %s3206_s23  ;;  %s2504_s20 = sld [smem:[#allocation5 + $0x31]] }
  0xf4   : > { %v661_v41 = vmul.f32 %v3213_v53, %v422_v52  ;;  %v712_v21 = vmul.f32 %v3214_v5, %v422_v52  ;;  %v3215_v10 = vstv %s3207_s29  ;;  %v464_v22 = vadd.f32 %v462_v16, %v2336_v59  ;;  %v3216_v59 = vld [vmem:[#allocation52_spill] sm:$0xff]  ;;  %v784_v16 = vpop.permute.xlu1 %783  ;;  %s2681_s2 = sld [smem:[#allocation5 + $0x57]] }
  0xf5   : > { %v763_v11 = vmul.f32 %v3215_v10, %v422_v52  ;;  %v515_v18 = vadd.f32 %v513_v13, %v2338_v63  ;;  %v566_v23 = vadd.f32 %v564_v12, %v2343_v46  ;;  %v826_v15 = vstv %s2435_s1  ;;  %s2685_s0 = sld [smem:[#allocation5 + $0x3c]] }
  0xf6   : > { %v617_v25 = vadd.f32 %v615_v55, %v2345_v29  ;;  %v663_v42 = vadd.f32 %v661_v41, %v2358_v56  ;;  %v714_v28 = vadd.f32 %v712_v21, %v2360_v27  ;;  %vm372_vm5 = vcmp.lt.s32.totalorder %v2462_v9, 16  ;;  %s2693_s1 = sld [smem:[#allocation5 + $0x43]] }
  0xf7   : > { %v765_v8 = vadd.f32 %v763_v11, %v2366_v30  ;;  %v470_v63 = vadd.f32 %v3216_v59, %v464_v22  ;;  %v521_v46 = vadd.f32 %v2382_v51, %v515_v18  ;;  %v572_v44 = vadd.f32 %v2387_v6, %v566_v23  ;;  %s2703_s23 = sld [smem:[#allocation5 + $0x4a]] }
  0xf8   : > { %v669_v29 = vadd.f32 %v2397_v24, %v663_v42  ;;  %v720_v56 = vadd.f32 %v2410_v38, %v714_v28  ;;  %v876_v3 = vstv %s2458_s16  ;;  %v926_v7 = vstv %s2466_s4  ;;  %s2709_s29 = sld [smem:[#allocation5 + $0x51]] }
  0xf9   : > { %v771_v27 = vadd.f32 %v2415_v43, %v765_v8  ;;  %v472_v30 = vrot.slane %v470_v63, 5  ;;  %v523_v61 = vrot.slane %v521_v46, 6  ;;  %v574_v14 = vrot.slane %v572_v44, 7  ;;  %s2716_s16 = sld [smem:[#allocation5 + $0x58]] }
  0xfa   : > { %v623_v51 = vadd.f32 %v2392_v26, %v617_v25  ;;  %v671_v6 = vrot.slane %v669_v29, 1  ;;  %v722_v1 = vrot.slane %v720_v56, 2  ;;  %v2597_v13 = vadd.f32 %v2439_v19, %v2430_v20  ;;  %s2722_s4 = sld [smem:[#allocation5 + $0x5e]] }
  0xfb   : > { %v773_v50 = vrot.slane %v771_v27, 3  ;;  %v474_v24 = vsel %vm473_vm14, %v471_v36, %v472_v30  ;;  %v2528_v38 = vsel %vm473_vm14, %v472_v30, %v471_v36  ;;  %v525_v43 = vsel %vm524_vm15, %v522_v40, %v523_v61 }
  0xfc   : > { %v2538_v26 = vsel %vm524_vm15, %v523_v61, %v522_v40  ;;  %v530_v31 = vadd.f32 %v525_v43, %v474_v24  ;;  %v576_v36 = vsel %vm575_vm0, %v573_v60, %v574_v14  ;;  %v2550_v48 = vsel %vm575_vm0, %v574_v14, %v573_v60  ;;  %v788_v40 = vpop.permute.xlu2 %787 }
  0xfd   : > { %v2556_v17 = vsel %vm672_vm1, %v670_v0, %v671_v6  ;;  %v674_v33 = vsel %vm672_vm1, %v671_v6, %v670_v0  ;;  %v2568_v60 = vsel %vm723_vm2, %v721_v57, %v722_v1  ;;  %v2574_v52 = vsel %vm723_vm2, %v722_v1, %v721_v57 }
  0xfe   : > { %v2580_v4 = vsel %vm774_vm3, %v772_v37, %v773_v50  ;;  %v581_v0 = vadd.f32 %v576_v36, %v530_v31  ;;  %v676_v32 = vsel %vm372_vm5, %v674_v33, 0.0  ;;  %v2590_v62 = vsel %vm774_vm3, %v773_v50, %v772_v37 }
  0xff   : > { %v976_v57 = vstv %s2473_s14  ;;  %v1022_v2 = vstv %s2482_s13  ;;  %v1072_v34 = vstv %s2492_s27  ;;  %v791_v37 = vsel %vm2155_vm10, %v788_v40, 0.0  ;;  %s2725_s14 = sld [smem:[#allocation5 + $0x5f]] }
 0x100   : > { %v627_v35 = vadd.f32 %v623_v51, %v581_v0  ;;  %v1122_v55 = vstv %s2498_s30  ;;  %v820_v53 = vstv %s2504_s20  ;;  %v870_v41 = vstv %s2510_s21  ;;  %v794_v0 = vpop.permute.xlu1 %793  ;;  %s2746_s13 = sld [smem:[#allocation5 + $0x36]] }
 0x101   : > { %v827_v20 = vmul.f32 %v826_v15, %v791_v37  ;;  %v877_v19 = vmul.f32 %v876_v3, %v791_v37  ;;  %v927_v5 = vmul.f32 %v926_v7, %v791_v37  ;;  %v977_v21 = vmul.f32 %v976_v57, %v791_v37  ;;  %s2753_s27 = sld [smem:[#allocation5 + $0x3d]] }
 0x102   : > { %v2620_v10 = vadd.f32 %v676_v32, %v627_v35  ;;  %v1023_v11 = vmul.f32 %v1022_v2, %v791_v37  ;;  %v1073_v22 = vmul.f32 %v1072_v34, %v791_v37  ;;  %v920_v18 = vstv %s2516_s22  ;;  %v790_v32 = vpop.permute.xlu0 %789  ;;  %s2761_s30 = sld [smem:[#allocation5 + $0x44]] }
 0x103   : > { %v970_v23 = vstv %s2519_s24  ;;  %v1016_v25 = vstv %s2522_s26  ;;  %v786_v28 = vsel %vm2175_vm11, %v784_v16, 0.0  ;;  %v785_v8 = vsel %vm2175_vm11, %v782_v54, 0.0  ;;  %s2765_s20 = sld [smem:[#allocation5 + $0x4b]] }
 0x104   : > { %v1123_v59 = vmul.f32 %v1122_v55, %v791_v37  ;;  %v1066_v63 = vstv %s2540_s5  ;;  %v1116_v46 = vstv %s2558_s18  ;;  %v822_v44 = vmul.f32 %v820_v53, %v786_v28  ;;  %s2769_s21 = sld [smem:[#allocation5 + $0x52]] }
 0x105   : > { %v2641_v29 = vmul.f32 %v870_v41, %v786_v28  ;;  %v2643_v56 = vmul.f32 %v920_v18, %v786_v28  ;;  %v2645_v27 = vmul.f32 %v970_v23, %v786_v28  ;;  %v821_v30 = vmul.f32 %v820_v53, %v785_v8  ;;  %s2775_s22 = sld [smem:[#allocation5 + $0x59]] }
 0x106   : > { %v871_v61 = vmul.f32 %v870_v41, %v785_v8  ;;  %v921_v14 = vmul.f32 %v920_v18, %v785_v8  ;;  %v971_v51 = vmul.f32 %v970_v23, %v785_v8  ;;  %v1017_v6 = vmul.f32 %v1016_v25, %v785_v8  ;;  %s2783_s24 = sld [smem:[#allocation5 + $0x60]] }
 0x107   : > { %v2649_v1 = vmul.f32 %v1016_v25, %v786_v28  ;;  %v2651_v50 = vmul.f32 %v1066_v63, %v786_v28  ;;  %v2653_v24 = vmul.f32 %v1116_v46, %v786_v28  ;;  %v1067_v43 = vmul.f32 %v1066_v63, %v785_v8  ;;  %s2788_s26 = sld [smem:[#allocation5 + $0x37]] }
 0x108   : > { %v829_v31 = vadd.f32 %v827_v20, %v821_v30  ;;  %v879_v36 = vadd.f32 %v877_v19, %v871_v61  ;;  %v1117_v40 = vmul.f32 %v1116_v46, %v785_v8  ;;  %v832_v33 = vstv %s2582_s17  ;;  %v796_v19 = vpop.permute.xlu2 %795  ;;  %s2797_s5 = sld [smem:[#allocation5 + $0x3e]] }
 0x109   : > { %v929_v16 = vadd.f32 %v927_v5, %v921_v14  ;;  %v979_v54 = vadd.f32 %v977_v21, %v971_v51  ;;  %v882_v37 = vstv %s2593_s3  ;;  %v932_v35 = vstv %s2603_s19  ;;  %s2804_s18 = sld [smem:[#allocation5 + $0x45]] }
 0x10a   : > { %v1025_v53 = vadd.f32 %v1023_v11, %v1017_v6  ;;  %v1075_v41 = vadd.f32 %v1073_v22, %v1067_v43  ;;  %v982_v18 = vstv %s2608_s28  ;;  %v1028_v20 = vstv %s2618_s10  ;;  %s2811_s17 = sld [smem:[#allocation5 + $0x4c]] }
 0x10b   : > { %v1078_v23 = vstv %s2627_s15  ;;  %v1128_v25 = vstv %s2635_s25  ;;  %v797_v28 = vsel %vm1974_vm4, %v794_v0, 0.0  ;;  %v792_v5 = vsel %vm2155_vm10, %v790_v32, 0.0  ;;  %s2820_s3 = sld [smem:[#allocation5 + $0x53]] }
 0x10c   : > { %v833_v21 = vmul.f32 %v832_v33, %v797_v28  ;;  %v883_v11 = vmul.f32 %v882_v37, %v797_v28  ;;  %v933_v22 = vmul.f32 %v932_v35, %v797_v28  ;;  %v983_v8 = vmul.f32 %v982_v18, %v797_v28  ;;  %s2824_s19 = sld [smem:[#allocation5 + $0x5a]] }
 0x10d   : > { %v1125_v63 = vadd.f32 %v1123_v59, %v1117_v40  ;;  %v828_v46 = vmul.f32 %v826_v15, %v792_v5  ;;  %v798_v30 = vsel %vm1974_vm4, %v796_v19, 0.0  ;;  %v838_v12 = vstv %s2647_s6  ;;  %s2829_s28 = sld [smem:[#allocation5 + $0x61]] }
 0x10e   : > { %v2683_v61 = vadd.f32 %v833_v21, %v829_v31  ;;  %v1029_v14 = vmul.f32 %v1028_v20, %v797_v28  ;;  %v1079_v51 = vmul.f32 %v1078_v23, %v797_v28  ;;  %v1129_v6 = vmul.f32 %v1128_v25, %v797_v28  ;;  %s3223_s10 = sld [smem:[#allocation27_spill]] }
 0x10f   : > { %v2687_v59 = vadd.f32 %v883_v11, %v879_v36  ;;  %v2689_v15 = vadd.f32 %v933_v22, %v929_v16  ;;  %v2691_v43 = vadd.f32 %v983_v8, %v979_v54  ;;  %v830_v40 = vadd.f32 %v828_v46, %v822_v44  ;;  %v804_v46 = vpop.permute.xlu1 %803  ;;  %s3224_s15 = sld [smem:[#allocation19_spill]] }
 0x110   : > { %v878_v0 = vmul.f32 %v876_v3, %v792_v5  ;;  %v928_v31 = vmul.f32 %v926_v7, %v792_v5  ;;  %v978_v32 = vmul.f32 %v976_v57, %v792_v5  ;;  %v1024_v19 = vmul.f32 %v1022_v2, %v792_v5  ;;  %s3225_s6 = sld [smem:[#allocation26_spill]] }
 0x111   : > { %v1074_v36 = vmul.f32 %v1072_v34, %v792_v5  ;;  %v1124_v16 = vmul.f32 %v1122_v55, %v792_v5  ;;  %v834_v42 = vmul.f32 %v832_v33, %v798_v30  ;;  %v884_v54 = vmul.f32 %v882_v37, %v798_v30  ;;  %v3220_v5 = vld [vmem:[#allocation28_spill] sm:$0xff] }
 0x112   : > { %v2711_v44 = vadd.f32 %v1029_v14, %v1025_v53  ;;  %v880_v3 = vadd.f32 %v878_v0, %v2641_v29  ;;  %v930_v7 = vadd.f32 %v928_v31, %v2643_v56  ;;  %v980_v57 = vadd.f32 %v978_v32, %v2645_v27 }
 0x113   : > { %v2718_v2 = vadd.f32 %v1079_v51, %v1075_v41  ;;  %v1026_v34 = vadd.f32 %v1024_v19, %v2649_v1  ;;  %v1076_v55 = vadd.f32 %v1074_v36, %v2651_v50  ;;  %v934_v33 = vmul.f32 %v932_v35, %v798_v30 }
 0x114   : > { %v1126_v29 = vadd.f32 %v1124_v16, %v2653_v24  ;;  %v984_v56 = vmul.f32 %v982_v18, %v798_v30  ;;  %v1030_v37 = vmul.f32 %v1028_v20, %v798_v30  ;;  %v1080_v27 = vmul.f32 %v1078_v23, %v798_v30 }
 0x115   : > { %v2727_v53 = vadd.f32 %v1129_v6, %v1125_v63  ;;  %v836_v41 = vadd.f32 %v834_v42, %v830_v40  ;;  %v886_v1 = vadd.f32 %v884_v54, %v880_v3  ;;  %v1130_v50 = vmul.f32 %v1128_v25, %v798_v30  ;;  %s1452_s25 = sshll.u32 %s3224_s15, 4 }
 0x116   : > { %v936_v35 = vadd.f32 %v934_v33, %v930_v7  ;;  %v986_v28 = vadd.f32 %v984_v56, %v980_v57  ;;  %v840_v24 = vmul.f32 %v838_v12, %v3220_v5  ;;  %v844_v18 = vstv %s2674_s12  ;;  %s3227_s12 = sshll.u32 %s3225_s6, 4 }
 0x117   : > { %v1032_v20 = vadd.f32 %v1030_v37, %v1026_v34  ;;  %v1082_v23 = vadd.f32 %v1080_v27, %v1076_v55  ;;  %v888_v21 = vstv %s2656_s7  ;;  %v938_v11 = vstv %s2660_s8 }
 0x118   : > { %v1132_v22 = vadd.f32 %v1130_v50, %v1126_v29  ;;  %v890_v8 = vmul.f32 %v888_v21, %v3220_v5  ;;  %v3088_v25 = vstv %s2685_s0  ;;  %v940_v63 = vmul.f32 %v938_v11, %v3220_v5 }
 0x119   : > { %v944_v30 = vstv %s2693_s1  ;;  %v988_v14 = vstv %s2664_s9  ;;  %v994_v51 = vstv %s2703_s23  ;;  %v1034_v6 = vstv %s2672_s11  ;;  %s3226_s9 = sld [smem:[#allocation55_spill]] }
 0x11a   : > { %v990_v40 = vmul.f32 %v988_v14, %v3220_v5  ;;  %v1036_v0 = vmul.f32 %v1034_v6, %v3220_v5  ;;  %v1040_v31 = vstv %s2709_s29  ;;  %v1084_v32 = vstv %s2681_s2  ;;  %s231_s2 = scalar_lea.vmem [#allocation11], %s3227_s12  ;;  %s1210_s29 = scalar_lea.sflag [#allocation8], %s3225_s6 }
 0x11b   : > { %v1086_v19 = vmul.f32 %v1084_v32, %v3220_v5  ;;  %v1090_v36 = vstv %s2716_s16  ;;  %v1134_v16 = vstv %s2722_s4  ;;  %v806_v42 = vsel %vm329_vm13, %v804_v46, 0.0 }
 0x11c   : > { %v1136_v54 = vmul.f32 %v1134_v16, %v3220_v5  ;;  %v1140_v3 = vstv %s2725_s14  ;;  %v846_v7 = vmul.f32 %v844_v18, %v806_v42  ;;  %v896_v57 = vmul.f32 %v3088_v25, %v806_v42 }
 0x11d   : > { %v842_v34 = vadd.f32 %v840_v24, %v836_v41  ;;  %v892_v55 = vadd.f32 %v890_v8, %v886_v1  ;;  %v942_v33 = vadd.f32 %v940_v63, %v936_v35  ;;  %v946_v29 = vmul.f32 %v944_v30, %v806_v42  ;;  %v3221_v24 = vld [vmem:[#allocation29_spill] sm:$0xff] }
 0x11e   : > { %v992_v56 = vadd.f32 %v990_v40, %v986_v28  ;;  %v996_v37 = vmul.f32 %v994_v51, %v806_v42  ;;  %v1038_v27 = vadd.f32 %v1036_v0, %v1032_v20  ;;  %v1042_v50 = vmul.f32 %v1040_v31, %v806_v42  ;;  %v802_v0 = vpop.permute.xlu0 %801 }
 0x11f   : > { %v2771_v5 = vadd.f32 %v846_v7, %v842_v34  ;;  %v2773_v46 = vadd.f32 %v896_v57, %v892_v55  ;;  %v1088_v25 = vadd.f32 %v1086_v19, %v1082_v23  ;;  %v1092_v41 = vmul.f32 %v1090_v36, %v806_v42  ;;  %s1221_s11 = scalar_lea.hbm %s3226_s9, %s1452_s25 }
 0x120   : > { %v2777_v1 = vadd.f32 %v946_v29, %v942_v33  ;;  %v1142_v35 = vmul.f32 %v1140_v3, %v806_v42  ;;  %v839_v28 = vmul.f32 %v838_v12, %v3221_v24  ;;  %v889_v8 = vmul.f32 %v888_v21, %v3221_v24  ;;  %s1224_s1 = sshll.u32 %s1221_s11, 4  ;;  %s1225_s1 = int_to_ptr.hbm [resolvable:$true] %s1224_s1 }
 0x121   : > { %v1138_v20 = vadd.f32 %v1136_v54, %v1132_v22  ;;  %v939_v63 = vmul.f32 %v938_v11, %v3221_v24  ;;  %v989_v40 = vmul.f32 %v988_v14, %v3221_v24  ;;  %v1035_v23 = vmul.f32 %v1034_v6, %v3221_v24  ;;  %s1627_s16 = sshra.s32 %s1225_s1, 4  ;;  %s1628_s16 = int_to_ptr.hbm [resolvable:$true] %s1627_s16 }
 0x122   : > { %v2790_v19 = vadd.f32 %v996_v37, %v992_v56  ;;  %v2792_v42 = vadd.f32 %v1042_v50, %v1038_v27  ;;  %v2794_v12 = vadd.f32 %v1092_v41, %v1088_v25  ;;  %v1085_v21 = vmul.f32 %v1084_v32, %v3221_v24  ;;  %s1629_s4 = scalar_lea.hbm %s1628_s16, 16  ;;  %p1634_p7 = scmp.lt.s32.totalorder %s1628_s16, %s3226_s9 }
 0x123   : > { %v2799_v11 = vadd.f32 %v1142_v35, %v1138_v20  ;;  %v841_v22 = vadd.f32 %v839_v28, %v2683_v61  ;;  %v891_v14 = vadd.f32 %v889_v8, %v2687_v59  ;;  %v1135_v6 = vmul.f32 %v1134_v16, %v3221_v24  ;;  %p1630_p4 = scmp.ne.s32.totalorder %s1628_s16, %s1629_s4 }
 0x124   : > { %v941_v54 = vadd.f32 %v939_v63, %v2689_v15  ;;  %v991_v25 = vadd.f32 %v989_v40, %v2691_v43  ;;  %v1037_v32 = vadd.f32 %v1035_v23, %v2711_v44  ;;  %v805_v7 = vsel %vm329_vm13, %v802_v0, 0.0 }
 0x125   : > { %v1087_v61 = vadd.f32 %v1085_v21, %v2718_v2  ;;  %v845_v59 = vmul.f32 %v844_v18, %v805_v7  ;;  %v3222_v16 = vstv %s2685_s0  ;;  %v945_v34 = vmul.f32 %v944_v30, %v805_v7  ;;  %v808_v30 = vpop.permute.xlu2 %807  ;;  %v814_v21 = vpop.permute.xlu1 %813  ;;  %s1222_s0 = sshll.u32 %s231_s2, 4  ;;  %p1631_p5 = pnand %p1630_p4, %p1790_p9  ;;  %s1223_s0 = int_to_ptr.vmem [resolvable:$true] %s1222_s0 }
 0x126   : > { %v895_v57 = vmul.f32 %v3222_v16, %v805_v7  ;;  %v995_v15 = vmul.f32 %v994_v51, %v805_v7  ;;  %v1041_v43 = vmul.f32 %v1040_v31, %v805_v7  ;;  %v1091_v58 = vmul.f32 %v1090_v36, %v805_v7 }
 0x127   : > { %v1141_v44 = vmul.f32 %v1140_v3, %v805_v7  ;;  %v1137_v2 = vadd.f32 %v1135_v6, %v2727_v53  ;;  %v847_v18 = vadd.f32 %v845_v59, %v841_v22  ;;  %v850_v55 = vstv %s2746_s13  ;;  %v810_v22 = vpop.permute.xlu0 %809  ;;  %p1632_p6 = pneg %p1631_p5 }
 0x128   : > { %v900_v33 = vstv %s2753_s27  ;;  %v897_v29 = vadd.f32 %v895_v57, %v891_v14  ;;  %v947_v51 = vadd.f32 %v945_v34, %v941_v54  ;;  %v2831_v56 = vadd.f32 %v995_v15, %v991_v25  ;;  %s1633_s27 = scalar_lea.hbm %s3226_s9, 32 }
 0x129   : > { %v950_v31 = vstv %s2761_s30  ;;  %v1043_v36 = vadd.f32 %v1041_v43, %v1037_v32  ;;  %v1046_v3 = vstv %s2769_s21  ;;  %v1096_v37 = vstv %s2775_s22  ;;  %p1635_p8 = scmp.lt.s32.totalorder %s1633_s27, %s1629_s4 }
 0x12a   : > { %v1146_v27 = vstv %s2783_s24  ;;  %v1093_v50 = vadd.f32 %v1091_v58, %v1087_v61  ;;  %v1143_v53 = vadd.f32 %v1141_v44, %v1137_v2  ;;  %v1000_v41 = vstv %s2765_s20 }
 0x12b   : > { %v811_v35 = vsel %vm333_vm9, %v808_v30, 0.0  ;;  %v856_v20 = vstv %s2788_s26  ;;  %v906_v0 = vstv %s2797_s5  ;;  %v956_v54 = vstv %s2804_s18  ;;  %p1636_p10 = por %p1635_p8, %p1634_p7 }
 0x12c   : > { %v851_v24 = vmul.f32 %v850_v55, %v811_v35  ;;  %v901_v28 = vmul.f32 %v900_v33, %v811_v35  ;;  %v951_v8 = vmul.f32 %v950_v31, %v811_v35  ;;  %v1047_v63 = vmul.f32 %v1046_v3, %v811_v35 }
 0x12d   : > { %v1097_v40 = vmul.f32 %v1096_v37, %v811_v35  ;;  %v1147_v23 = vmul.f32 %v1146_v27, %v811_v35  ;;  %v1006_v25 = vstv %s2811_s17  ;;  %v1052_v59 = vstv %s2820_s3  ;;  %p1637_p13 = pnand %p1636_p10, %p1632_p6 }
 0x12e   : > { %v853_v14 = vadd.f32 %v851_v24, %v847_v18  ;;  %v903_v6 = vadd.f32 %v901_v28, %v897_v29  ;;  %v953_v32 = vadd.f32 %v951_v8, %v947_v51  ;;  %v1049_v7 = vadd.f32 %v1047_v63, %v1043_v36 }
 0x12f   : > { %v1099_v61 = vadd.f32 %v1097_v40, %v1093_v50  ;;  %v1102_v16 = vstv %s2824_s19  ;;  %v1152_v57 = vstv %s2829_s28  ;;  %v817_v34 = vsel %vm337_vm12, %v814_v21, 0.0 }
 0x130   : > { %v812_v15 = vsel %vm333_vm9, %v810_v22, 0.0  ;;  %v1149_v43 = vadd.f32 %v1147_v23, %v1143_v53  ;;  %v857_v58 = vmul.f32 %v856_v20, %v817_v34  ;;  %v907_v44 = vmul.f32 %v906_v0, %v817_v34 }
 0x131   : > { %v957_v2 = vmul.f32 %v956_v54, %v817_v34  ;;  %v1053_v18 = vmul.f32 %v1052_v59, %v817_v34  ;;  %v1103_v30 = vmul.f32 %v1102_v16, %v817_v34  ;;  %v1153_v29 = vmul.f32 %v1152_v57, %v817_v34 }
 0x132   : > { %v852_v51 = vmul.f32 %v850_v55, %v812_v15  ;;  %v2863_v36 = vmul.f32 %v1000_v41, %v811_v35  ;;  %v2865_v50 = vadd.f32 %v857_v58, %v853_v14  ;;  %v2867_v39 = vadd.f32 %v907_v44, %v903_v6 }
 0x133   : > { %v2869_v53 = vadd.f32 %v957_v2, %v953_v32  ;;  %v2873_v24 = vmul.f32 %v1006_v25, %v817_v34  ;;  %v2875_v28 = vadd.f32 %v1053_v18, %v1049_v7  ;;  %v2877_v8 = vadd.f32 %v1103_v30, %v1099_v61 }
 0x134   : > { %v2879_v63 = vadd.f32 %v1153_v29, %v1149_v43  ;;  %v861_v40 = vrot.slane %v2865_v50, 5  ;;  %v911_v55 = vrot.slane %v2867_v39, 6  ;;  %v854_v35 = vadd.f32 %v852_v51, %v2771_v5 }
 0x135   : > { %v902_v23 = vmul.f32 %v900_v33, %v812_v15  ;;  %v961_v21 = vrot.slane %v2869_v53, 7  ;;  %v1057_v22 = vrot.slane %v2875_v28, 1  ;;  %v1107_v14 = vrot.slane %v2877_v8, 2 }
 0x136   : > { %v952_v6 = vmul.f32 %v950_v31, %v812_v15  ;;  %v1002_v7 = vmul.f32 %v1000_v41, %v812_v15  ;;  %v1048_v61 = vmul.f32 %v1046_v3, %v812_v15  ;;  %v1098_v34 = vmul.f32 %v1096_v37, %v812_v15 }
 0x137   : > { %v904_v32 = vadd.f32 %v902_v23, %v2773_v46  ;;  %v1148_v58 = vmul.f32 %v1146_v27, %v812_v15  ;;  %v339_v44 = vadd.s32 4294967293, %v3203_v45  ;;  %v347_v5 = vadd.s32 4294967294, %v3203_v45  ;;  %v816_v46 = vpop.permute.xlu2 %815 }
 0x138   : > { %v954_v43 = vadd.f32 %v952_v6, %v2777_v1  ;;  %v1004_v33 = vadd.f32 %v1002_v7, %v2790_v19  ;;  %v1050_v2 = vadd.f32 %v1048_v61, %v2792_v42  ;;  %v1100_v18 = vadd.f32 %v1098_v34, %v2794_v12 }
 0x139   : > { %v355_v31 = vadd.s32 4294967295, %v3203_v45  ;;  %v1150_v3 = vadd.f32 %v1148_v58, %v2799_v11  ;;  %vm341_vm4 = vcmp.ge.s32.totalorder %v339_v44, 0  ;;  %vm349_vm6 = vcmp.ge.s32.totalorder %v347_v5, 0 }
 0x13a   : > { %v376_v1 = vadd.s32 2, %v2451_v47  ;;  %v2898_v37 = vadd.s32 3, %v2451_v47  ;;  %v476_v19 = vsel %vm341_vm4, %v2528_v38, 0.0  ;;  %v527_v42 = vsel %vm349_vm6, %v2538_v26, 0.0 }
 0x13b   : > { %vm357_vm7 = vcmp.ge.s32.totalorder %v355_v31, 0  ;;  %v529_v12 = vadd.f32 %v527_v42, %v476_v19  ;;  %v818_v27 = vsel %vm337_vm12, %v816_v46, 0.0  ;;  %v1003_v19 = vadd.f32 %v2863_v36, %v2831_v56 }
 0x13c   : > { %vm380_vm8 = vcmp.lt.s32.totalorder %v376_v1, 16  ;;  %v578_v11 = vsel %vm357_vm7, %v2550_v48, 0.0  ;;  %vm388_vm9 = vcmp.lt.s32.totalorder %v2898_v37, 16  ;;  %v858_v38 = vmul.f32 %v856_v20, %v818_v27 }
 0x13d   : > { %v727_v47 = vsel %vm380_vm8, %v2574_v52, 0.0  ;;  %v908_v41 = vmul.f32 %v906_v0, %v818_v27  ;;  %v580_v26 = vadd.f32 %v578_v11, %v529_v12  ;;  %v778_v48 = vsel %vm388_vm9, %v2590_v62, 0.0 }
 0x13e   : > { %v729_v15 = vadd.f32 %v727_v47, %v2620_v10  ;;  %v958_v49 = vmul.f32 %v956_v54, %v818_v27  ;;  %v860_v30 = vadd.f32 %v858_v38, %v854_v35  ;;  %v1008_v51 = vmul.f32 %v1006_v25, %v818_v27  ;;  %v1166_v38 = vld [vmem:[%s3223_s10 + $0x8] sm:$0xff] }
 0x13f   : > { %v910_v29 = vadd.f32 %v908_v41, %v904_v32  ;;  %v1054_v52 = vmul.f32 %v1052_v59, %v818_v27  ;;  %v626_v20 = vadd.f32 %v2597_v13, %v580_v26  ;;  %v1104_v39 = vmul.f32 %v1102_v16, %v818_v27 }
 0x140   : > { %v780_v50 = vadd.f32 %v778_v48, %v729_v15  ;;  %v960_v0 = vadd.f32 %v958_v49, %v954_v43  ;;  %v862_v10 = vrot.slane %v860_v30, 5  ;;  %v1010_v6 = vadd.f32 %v1008_v51, %v1004_v33  ;;  %v1165_v15 = vld [vmem:[%s3223_s10] sm:$0xff] }
 0x141   : > { %v912_v23 = vrot.slane %v910_v29, 6  ;;  %v1056_v7 = vadd.f32 %v1054_v52, %v1050_v2  ;;  %v677_v62 = vadd.f32 %v2556_v17, %v626_v20  ;;  %v1106_v61 = vadd.f32 %v1104_v39, %v1100_v18 }
 0x142   : > { %v962_v54 = vrot.slane %v960_v0, 7  ;;  %v1154_v35 = vmul.f32 %v1152_v57, %v818_v27  ;;  %v863_v25 = vsel %vm473_vm14, %v861_v40, %v862_v10  ;;  %v864_v13 = vsel %vm473_vm14, %v862_v10, %v861_v40 }
 0x143   : > { %v913_v59 = vsel %vm524_vm15, %v911_v55, %v912_v23  ;;  %v914_v16 = vsel %vm524_vm15, %v912_v23, %v911_v55  ;;  %v728_v32 = vadd.f32 %v2568_v60, %v677_v62  ;;  %v865_v17 = vsel %vm341_vm4, %v864_v13, 0.0 }
 0x144   : > { %v868_v34 = vadd.f32 %v863_v25, %v780_v50  ;;  %v915_v43 = vsel %vm349_vm6, %v914_v16, 0.0  ;;  %v963_v57 = vsel %vm575_vm0, %v961_v21, %v962_v54  ;;  %v964_v40 = vsel %vm575_vm0, %v962_v54, %v961_v21 }
 0x145   : > { %v1058_v58 = vrot.slane %v1056_v7, 1  ;;  %v1108_v33 = vrot.slane %v1106_v61, 2  ;;  %v779_v55 = vadd.f32 %v2580_v4, %v728_v32  ;;  %v965_v44 = vsel %vm357_vm7, %v964_v40, 0.0 }
 0x146   : > { %v918_v60 = vadd.f32 %v913_v59, %v868_v34  ;;  %v1156_v2 = vadd.f32 %v1154_v35, %v1150_v3  ;;  %v1009_v9 = vadd.f32 %v2873_v24, %v1003_v19 }
 0x147   : > { %v1059_v5 = vsel %vm672_vm1, %v1057_v22, %v1058_v58  ;;  %v1060_v53 = vsel %vm672_vm1, %v1058_v58, %v1057_v22  ;;  %v1109_v21 = vsel %vm723_vm2, %v1107_v14, %v1108_v33  ;;  %v1110_v4 = vsel %vm723_vm2, %v1108_v33, %v1107_v14 }
 0x148   : > { %v867_v18 = vadd.f32 %v865_v17, %v779_v55  ;;  %v968_v31 = vadd.f32 %v963_v57, %v918_v60  ;;  %v1062_v46 = vsel %vm372_vm5, %v1060_v53, 0.0  ;;  %v1112_v28 = vsel %vm380_vm8, %v1110_v4, 0.0 }
 0x149   : > { %v1157_v22 = vrot.slane %v2879_v63, 3  ;;  %v1158_v3 = vrot.slane %v1156_v2, 3 }
 0x14a   : > { %v917_v42 = vadd.f32 %v915_v43, %v867_v18  ;;  %v1014_v8 = vadd.f32 %v1010_v6, %v968_v31 }
 0x14b   : > { %v1159_v14 = vsel %vm774_vm3, %v1157_v22, %v1158_v3  ;;  %v1160_v12 = vsel %vm774_vm3, %v1158_v3, %v1157_v22 }
 0x14c   : > { %v967_v11 = vadd.f32 %v965_v44, %v917_v42  ;;  %v1064_v1 = vadd.f32 %v1062_v46, %v1014_v8  ;;  %v1162_v63 = vsel %vm388_vm9, %v1160_v12, 0.0 }
 0x14e   : > { %v1013_v27 = vadd.f32 %v1009_v9, %v967_v11  ;;  %v1114_v47 = vadd.f32 %v1112_v28, %v1064_v1 }
 0x150   : > { %v1063_v56 = vadd.f32 %v1059_v5, %v1013_v27  ;;  %v1164_v36 = vadd.f32 %v1162_v63, %v1114_v47 }
 0x152   : > { %v1113_v41 = vadd.f32 %v1109_v21, %v1063_v56  ;;  %v1168_v26 = vadd.f32 %v1166_v38, %v1164_v36 }
 0x154   : > { %v1163_v48 = vadd.f32 %v1159_v14, %v1113_v41  ;;  %v1444_v49 = vmul.f32 -1.442695, %v1168_v26 }
 0x156   : > { %v1167_v45 = vadd.f32 %v1165_v15, %v1163_v48  ;;  %1533 = vpow2.f32 %v1444_v49 }
 0x158   : > { %v1443_v30 = vmul.f32 -1.442695, %v1167_v45 }
 0x15a   : > { %1535 = vpow2.f32 %v1443_v30 }
 0x15c   : > { %v1534_v24 = vpop.eup %1533 }
 0x15d   : > { %v1176_v29 = vadd.f32 1.0, %v1534_v24 }
 0x15f   : > { %1537 = vrcp.f32 %v1176_v29  ;;  %v1201_v39 = vand.u32 2147483647, %v1176_v29  ;;  %v1203_v10 = vand.u32 2147483648, %v1176_v29  ;;  %vm1197_vm11 = vweird.f32 %v1176_v29 }
 0x160   : > { %v1536_v37 = vpop.eup %1535 }
 0x161   : > { %v1175_v51 = vadd.f32 1.0, %v1536_v37  ;;  %vm1202_vm13 = vcmp.eq.f32.partialorder %v1201_v39, 8.507059e+37  ;;  %v1204_v61 = vor.u32 1.1754944e-38, %v1203_v10 }
 0x163   : > { %1539 = vrcp.f32 %v1175_v51  ;;  %v1188_v54 = vand.u32 2147483648, %v1175_v51  ;;  %v1186_v25 = vand.u32 2147483647, %v1175_v51  ;;  %vm1182_vm15 = vweird.f32 %v1175_v51 }
 0x165   : > { %v1538_v52 = vpop.eup %1537  ;;  %v1189_v32 = vor.u32 1.1754944e-38, %v1188_v54  ;;  %vm1187_vm1 = vcmp.eq.f32.partialorder %v1186_v25, 8.507059e+37 }
 0x166   : > { %v1193_v20 = vmul.f32 %v1538_v52, %v1176_v29  ;;  %vm1198_vm10 = vweird.f32 %v1538_v52 }
 0x167   : > { %vm1199_vm12 = vmor %vm1197_vm11, %vm1198_vm10 }
 0x168   : > { %v1194_v50 = vsub.f32 1.0, %v1193_v20 }
 0x169   : > { %v1540_v0 = vpop.eup %1539 }
 0x16a   : > { %v1178_v23 = vmul.f32 %v1540_v0, %v1175_v51  ;;  %v1195_v6 = vmul.f32 %v1538_v52, %v1194_v50  ;;  %vm1183_vm14 = vweird.f32 %v1540_v0 }
 0x16b   : > { %vm1184_vm0 = vmor %vm1182_vm15, %vm1183_vm14 }
 0x16c   : > { %v1179_v7 = vsub.f32 1.0, %v1178_v23  ;;  %v1196_v62 = vadd.f32 %v1538_v52, %v1195_v6 }
 0x16e   : > { %v1180_v35 = vmul.f32 %v1540_v0, %v1179_v7  ;;  %v1200_v13 = vsel %vm1199_vm12, %v1538_v52, %v1196_v62 }
 0x16f   : > { %v1205_v59 = vsel %vm1202_vm13, %v1204_v61, %v1200_v13 }
 0x170   : > { %v1181_v16 = vadd.f32 %v1540_v0, %v1180_v35  ;;  %1208 = vst [vmem:[%s231_s2 + $0x8] sm:$0xff] %v1205_v59 }
 0x172   : > { %v1185_v17 = vsel %vm1184_vm0, %v1540_v0, %v1181_v16 }
 0x173   : > { %v1190_v34 = vsel %vm1187_vm1, %v1189_v32, %v1185_v17 }
 0x174   : > { %1207 = vst [vmem:[%s231_s2] sm:$0xff] %v1190_v34 }
 0x175   : > { %1640 = shalt.err (!%p1637_p13)
}
 0x176   : > { %s1714_s21 = smov 128   ;;  %s1715_s22 = smov 8  }
 0x177   : > { %1457 = dma.vmem_to_hbm [thread:$0]  (%p1790_p9), %s1223_s0, 256, %s1225_s1, %s1210_s29, %s1714_s21, %s1714_s21, %s1715_s22  }
 0x178 PF: > { %s3229_s24 = sld [smem:[#allocation16_spill]]  ;;  %p1467_p0 = pnand %p1335_p12, %p1797_p11 }
 0x179   : > { %s3231_s5 = sld [smem:[#allocation21_spill]] }
 0x17a   : > { %p1468_p1 = pneg %p1467_p0 }
 0x17e   : > { %s1239_s18 = sand.u32 1, %s3229_s24  }
 0x17f   : > { %s1240_s17 = scalar_lea.sflag [#allocation8], %s1239_s18 }
 0x180   : > { %1676 = dma.done.wait (%p1468_p1), %s1240_s17, 256  }
 0x181   : > { %1678 = vsyncadd (%p1468_p1), %s1240_s17, 4294967040  ;;  %s30_s20 = sadd.s32 1, %s3231_s5   ;;  %s3232_s16 = sld [smem:[#allocation17_spill]] }
 0x182   : > { %p27_p2 = scmp.ge.s32.totalorder %s30_s20, 4   ;;  %s3233_s17 = sld [smem:[#allocation18_spill]] }
 0x183   : > { %s3234_s18 = sld [smem:[#allocation24_spill]] }
 0x184   : > { %s3235_s19 = sld [smem:[#allocation20_spill]]  ;;  %29 = sbr.rel (!%p27_p2) target bundleno = 16 (0x10), region = 94 }
 0x185   : > { %s3236_s0 = sld [smem:[#allocation22_spill]] }
 0x189   :  { %1246 = vsyncpa [#allocation7], 1 }
 0x18a   :  { %1248 = vsyncpa [#allocation7 + $0x1], 1 }
 0x18b   :  { %1249 = vsyncpa [#allocation10], 1 }
 0x18c   :  { %1251 = vsyncpa [#allocation10 + $0x1], 1 }
 0x18d   :  { %1252 = vsyncpa [#allocation8], 1 }
 0x18e   :  { %1254 = vsyncpa [#allocation8 + $0x1], 1 }

</bundles_post_ra>
